<compile_context>
chip_gen: v5e
topology: v5e:2x2
jax: 0.10.0
libtpu: 0.0.40
codegen_flags: <defaults>
</compile_context>

<pallas_src>
import functools

import jax
import jax.numpy as jnp
from jax.experimental import pallas as pl
from jax.experimental.pallas import tpu as pltpu


def _round_up(x, m):
    return (x + m - 1) // m * m


def _clip_text_cls_kernel(scale_ref, x_ref, tf_ref, bias_ref, o_ref, *, apply_softmax):
    x = x_ref[...].astype(jnp.float32)                       # (TB, D)
    # ---- L2 normalize rows; fold exp(logit_scale) into the per-row scale ----
    ss = jnp.sum(x * x, axis=-1, keepdims=True)              # (TB, 1)
    # max() guard only matters for zero-padded batch rows; real rows unaffected.
    row_scale = scale_ref[0] * jax.lax.rsqrt(jnp.maximum(ss, 1e-30))
    xn = (x * row_scale).astype(tf_ref.dtype)                # bf16/f32 MXU input
    # ---- class logits: (TB, D) @ (D, NCp) on the MXU, f32 accumulation ----
    logits = jnp.dot(xn, tf_ref[...], preferred_element_type=jnp.float32)
    logits = logits + bias_ref[...]                          # padded lanes get -1e30
    if apply_softmax:
        m = jnp.max(logits, axis=-1, keepdims=True)
        p = jnp.exp(logits - m)
        denom = jnp.sum(p, axis=-1, keepdims=True)
        logits = p / denom                                   # exact: rows sum to 1 in f32
    o_ref[...] = logits.astype(o_ref.dtype)


def clip_text_classifier(x, text_features, logit_scale, bias=None, training=False,
                         compute_dtype=jnp.bfloat16):
    """x: (B, D), text_features: (D, NC). Returns (B, NC) probs (eval) / logits (train)."""
    B, D = x.shape
    D2, NC = text_features.shape
    assert D == D2, "embed_dim mismatch"
    out_dtype = x.dtype

    NCp = _round_up(NC, 128)                     # lane-dense class dim (unmasked stores)
    bytes_cd = jnp.dtype(compute_dtype).itemsize
    bytes_out = jnp.dtype(out_dtype).itemsize

    # ---- derive row tile from a VMEM budget (safe on v7x's 64 MiB/TC) ----
    resident = D * NCp * bytes_cd + NCp * 4      # single-buffered text_features + bias

    def footprint(tb):
        return (2 * tb * D * bytes_cd            # x tile, double-buffered
                + 2 * tb * NCp * bytes_out       # out tile, double-buffered
                + tb * (3 * NCp * 4 + D * bytes_cd)   # f32 temporaries headroom
                + resident)

    VMEM_BUDGET = 40 * 1024 * 1024
    tb_cap = 512
    while tb_cap > 8 and footprint(tb_cap) > VMEM_BUDGET:
        tb_cap //= 2
    # Split B evenly over grid steps -> tail padding bounded by 7 rows.
    steps = -(-B // tb_cap)
    TB = min(tb_cap, _round_up(-(-B // steps), 8))
    B_pad = _round_up(B, TB)

    # ---- prepare operands ----
    x_p = x.astype(compute_dtype)
    if B_pad != B:
        x_p = jnp.pad(x_p, ((0, B_pad - B), (0, 0)))
    tf_p = text_features.astype(compute_dtype)
    bias_full = jnp.zeros((NC,), jnp.float32) if bias is None else bias.astype(jnp.float32)
    if NCp != NC:
        tf_p = jnp.pad(tf_p, ((0, 0), (0, NCp - NC)))
        # padded class lanes MUST be -inf-ish so the softmax ignores them
        bias_full = jnp.pad(bias_full, (0, NCp - NC), constant_values=-1e30)
    bias2d = bias_full.reshape(1, NCp)
    scale = jnp.exp(logit_scale).reshape(1).astype(jnp.float32)   # exp done once

    vmem_limit = int(min(max(footprint(TB) + (4 << 20), 16 << 20), 48 << 20))
    kernel = functools.partial(_clip_text_cls_kernel, apply_softmax=not training)

    def build(single_buffer_resident):
        resident_kw = ({"pipeline_mode": pl.Buffered(1)} if single_buffer_resident else {})
        return pl.pallas_call(
            kernel,
            out_shape=jax.ShapeDtypeStruct((B_pad, NCp), out_dtype),
            grid_spec=pl.GridSpec(
                grid=(B_pad // TB,),
                in_specs=[
                    pl.BlockSpec(memory_space=pltpu.MemorySpace.SMEM),           # exp(logit_scale)
                    pl.BlockSpec((TB, D), lambda i: (i, 0)),                     # x row tile
                    pl.BlockSpec((D, NCp), lambda i: (0, 0), **resident_kw),     # text_features
                    pl.BlockSpec((1, NCp), lambda i: (0, 0), **resident_kw),     # bias
                ],
                out_specs=pl.BlockSpec((TB, NCp), lambda i: (i, 0)),
            ),
            compiler_params=pltpu.CompilerParams(
                # TODO(synk): on v7x use pltpu.CORE_PARALLEL here to shard row tiles
                # across both TensorCores; "parallel" kept for portability.
                dimension_semantics=("parallel",),
                vmem_limit_bytes=vmem_limit,
            ),
        )

    # TODO(synk): for NC >~ 8-16k, tile the class dim with an inner "arbitrary"
    # grid axis + two-pass softmax instead of keeping (D, NCp) resident.
    try:
        out = build(True)(scale, x_p, tf_p, bias2d)
    except Exception:
        # Fallback if this jax version rejects Buffered(1) on a resident block.
        out = build(False)(scale, x_p, tf_p, bias2d)
    return out[:B, :NC]


def reference_forward(x, text_features, logit_scale, bias=None, training=False):
    """Plain-JAX mirror of the PyTorch forward, for a sanity check."""
    xn = x / jnp.linalg.norm(x, axis=1, keepdims=True)
    logits = jnp.exp(logit_scale) * (xn @ text_features)
    if bias is not None:
        logits = logits + bias
    if not training:
        logits = jax.nn.softmax(logits, axis=1)
    return logits


if __name__ == "__main__":
    # Module-consistent small shapes: CLIP ViT-B/16 embed_dim=512, Kinetics-400 classes.
    B, D, NC = 2, 512, 400
    key = jax.random.PRNGKey(0)
    kx, kt, kb = jax.random.split(key, 3)

    x = jax.random.normal(kx, (B, D), jnp.float32)
    text_features = jax.random.normal(kt, (D, NC), jnp.float32)
    # Unit-norm class embeddings, like the registered buffer in the module.
    text_features = text_features / jnp.linalg.norm(text_features, axis=0, keepdims=True)
    logit_scale = jnp.float32(jnp.log(100.0))       # ~CLIP's learned ln(1/0.07)
    bias = 0.01 * jax.random.normal(kb, (NC,), jnp.float32)

    ref = reference_forward(x, text_features, logit_scale, bias=bias, training=False)

    # Exact f32 path: strict check against the PyTorch-equivalent reference.
    out_f32 = clip_text_classifier(x, text_features, logit_scale, bias=bias,
                                   training=False, compute_dtype=jnp.float32)
    out_f32 = jax.block_until_ready(out_f32)
    assert out_f32.shape == (B, NC)
    assert bool(jnp.all(jnp.isfinite(out_f32)))
    assert jnp.allclose(jnp.sum(out_f32, axis=1), 1.0, atol=1e-3), "softmax rows must sum to 1"
    assert jnp.allclose(out_f32, ref, atol=2e-3, rtol=2e-3), "mismatch vs reference (f32 path)"

    # Default bf16-I/O path (halved recurring HBM traffic): looser tolerance.
    out_bf16 = clip_text_classifier(x, text_features, logit_scale, bias=bias, training=False)
    out_bf16 = jax.block_until_ready(out_bf16)
    assert out_bf16.shape == (B, NC)
    assert bool(jnp.all(jnp.isfinite(out_bf16)))
    assert jnp.allclose(jnp.sum(out_bf16, axis=1), 1.0, atol=1e-3), "softmax rows must sum to 1"
    assert jnp.allclose(out_bf16, ref, atol=5e-2, rtol=5e-2), "mismatch vs reference (bf16 path)"

    print("KERNEL_OK")
</pallas_src>

<mosaic_0001>
module attributes {stable_mosaic.version = 11 : i64} {
  func.func @_clip_text_cls_kernel(%arg0: i32, %arg1: memref<1xf32, #tpu.memory_space<smem>>, %arg2: memref<8x512xf32, #tpu.memory_space<vmem>>, %arg3: memref<512x512xf32, #tpu.memory_space<vmem>>, %arg4: memref<1x512xf32, #tpu.memory_space<vmem>>, %arg5: memref<8x512xf32, #tpu.memory_space<vmem>>) attributes {dimension_semantics = [#tpu.dimension_semantics<parallel>], iteration_bounds = array<i64: 1>, scalar_prefetch = 0 : i64, scratch_operands = 0 : i64, tpu.core_type = #tpu.core_type<tc>, window_params = [{transform_indices = @transform_0, window_bounds = array<i64: 1>}, {transform_indices = @transform_1, window_bounds = array<i64: 8, 512>}, {pipeline_mode = #tpu.pipeline_mode<synchronous>, transform_indices = @transform_2, window_bounds = array<i64: 512, 512>}, {pipeline_mode = #tpu.pipeline_mode<synchronous>, transform_indices = @transform_3, window_bounds = array<i64: 1, 512>}, {transform_indices = @transform_4, window_bounds = array<i64: 8, 512>}]} {
    %c0 = arith.constant 0 : index
    %c0_0 = arith.constant 0 : index
    %0 = vector.load %arg2[%c0, %c0_0] : memref<8x512xf32, #tpu.memory_space<vmem>>, vector<8x512xf32>
    %1 = arith.mulf %0, %0 : vector<8x512xf32>
    %cst = arith.constant dense<0.000000e+00> : vector<8xf32>
    %2 = vector.multi_reduction <add>, %1, %cst [1] : vector<8x512xf32> to vector<8xf32>
    %3 = vector.shape_cast %2 : vector<8xf32> to vector<8x1xf32>
    %c0_1 = arith.constant 0 : index
    %4 = memref.load %arg1[%c0_1] : memref<1xf32, #tpu.memory_space<smem>>
    %cst_2 = arith.constant 1.000000e-30 : f32
    %5 = vector.broadcast %cst_2 : f32 to vector<8x1xf32>
    %6 = arith.maximumf %3, %5 : vector<8x1xf32>
    %7 = math.rsqrt %6 : vector<8x1xf32>
    %8 = vector.broadcast %4 : f32 to vector<8x1xf32>
    %9 = arith.mulf %8, %7 : vector<8x1xf32>
    %10 = vector.broadcast %9 : vector<8x1xf32> to vector<8x512xf32>
    %11 = arith.mulf %0, %10 : vector<8x512xf32>
    %c0_3 = arith.constant 0 : index
    %c0_4 = arith.constant 0 : index
    %12 = vector.load %arg3[%c0_3, %c0_4] : memref<512x512xf32, #tpu.memory_space<vmem>>, vector<512x512xf32>
    %cst_5 = arith.constant dense<0.000000e+00> : vector<8x512xf32>
    %13 = tpu.matmul %11, %12, %cst_5 {dimension_numbers = #tpu.dot_dimension_numbers<[1], [0], [0], [1], [0, 0, 1, 1], [], []>} : vector<8x512xf32>, vector<512x512xf32>, vector<8x512xf32> -> vector<8x512xf32>
    %c0_6 = arith.constant 0 : index
    %c0_7 = arith.constant 0 : index
    %14 = vector.load %arg4[%c0_6, %c0_7] : memref<1x512xf32, #tpu.memory_space<vmem>>, vector<1x512xf32>
    %15 = vector.broadcast %14 : vector<1x512xf32> to vector<8x512xf32>
    %16 = arith.addf %13, %15 : vector<8x512xf32>
    %cst_8 = arith.constant dense<0xFF800000> : vector<8xf32>
    %17 = vector.multi_reduction <maximumf>, %16, %cst_8 [1] : vector<8x512xf32> to vector<8xf32>
    %18 = vector.shape_cast %17 : vector<8xf32> to vector<8x1xf32>
    %19 = vector.broadcast %18 : vector<8x1xf32> to vector<8x512xf32>
    %20 = arith.subf %16, %19 : vector<8x512xf32>
    %21 = math.exp %20 : vector<8x512xf32>
    %cst_9 = arith.constant dense<0.000000e+00> : vector<8xf32>
    %22 = vector.multi_reduction <add>, %21, %cst_9 [1] : vector<8x512xf32> to vector<8xf32>
    %23 = vector.shape_cast %22 : vector<8xf32> to vector<8x1xf32>
    %24 = vector.broadcast %23 : vector<8x1xf32> to vector<8x512xf32>
    %25 = arith.divf %21, %24 : vector<8x512xf32>
    %c0_10 = arith.constant 0 : index
    %c0_11 = arith.constant 0 : index
    %26 = vector.load %arg5[%c0_10, %c0_11] : memref<8x512xf32, #tpu.memory_space<vmem>>, vector<8x512xf32>
    tpu.vector_store %arg5[%c0_10, %c0_11], %25 {strides = array<i32>} : memref<8x512xf32, #tpu.memory_space<vmem>>, vector<8x512xf32>,
    return
  }
  func.func @transform_0(%arg0: i32) -> i32 {
    %c0_i32 = arith.constant 0 : i32
    %c0_i32_0 = arith.constant 0 : i32
    return %c0_i32 : i32
  }
  func.func @transform_1(%arg0: i32) -> (i32, i32) {
    %c0_i32 = arith.constant 0 : i32
    %c0_i32_0 = arith.constant 0 : i32
    return %arg0, %c0_i32 : i32, i32
  }
  func.func @transform_2(%arg0: i32) -> (i32, i32) {
    %c0_i32 = arith.constant 0 : i32
    %c0_i32_0 = arith.constant 0 : i32
    %c0_i32_1 = arith.constant 0 : i32
    return %c0_i32, %c0_i32_0 : i32, i32
  }
  func.func @transform_3(%arg0: i32) -> (i32, i32) {
    %c0_i32 = arith.constant 0 : i32
    %c0_i32_0 = arith.constant 0 : i32
    %c0_i32_1 = arith.constant 0 : i32
    return %c0_i32, %c0_i32_0 : i32, i32
  }
  func.func @transform_4(%arg0: i32) -> (i32, i32) {
    %c0_i32 = arith.constant 0 : i32
    %c0_i32_0 = arith.constant 0 : i32
    return %arg0, %c0_i32 : i32, i32
  }
}

module attributes {stable_mosaic.version = 11 : i64} {
  func.func @_clip_text_cls_kernel(%arg0: i32, %arg1: memref<1xf32, #tpu.memory_space<smem>>, %arg2: memref<8x512xf32, #tpu.memory_space<vmem>>, %arg3: memref<512x512xf32, #tpu.memory_space<vmem>>, %arg4: memref<1x512xf32, #tpu.memory_space<vmem>>, %arg5: memref<8x512xf32, #tpu.memory_space<vmem>>) attributes {dimension_semantics = [#tpu.dimension_semantics<parallel>], iteration_bounds = array<i64: 1>, scalar_prefetch = 0 : i64, scratch_operands = 0 : i64, tpu.core_type = #tpu.core_type<tc>, window_params = [{transform_indices = @transform_0, window_bounds = array<i64: 1>}, {transform_indices = @transform_1, window_bounds = array<i64: 8, 512>}, {pipeline_mode = #tpu.pipeline_mode<synchronous>, transform_indices = @transform_2, window_bounds = array<i64: 512, 512>}, {pipeline_mode = #tpu.pipeline_mode<synchronous>, transform_indices = @transform_3, window_bounds = array<i64: 1, 512>}, {transform_indices = @transform_4, window_bounds = array<i64: 8, 512>}]} {
    %c0 = arith.constant 0 : index
    %c0_0 = arith.constant 0 : index
    %0 = vector.load %arg2[%c0, %c0_0] : memref<8x512xf32, #tpu.memory_space<vmem>>, vector<8x512xf32>
    %1 = arith.mulf %0, %0 : vector<8x512xf32>
    %cst = arith.constant dense<0.000000e+00> : vector<8xf32>
    %2 = vector.multi_reduction <add>, %1, %cst [1] : vector<8x512xf32> to vector<8xf32>
    %3 = vector.shape_cast %2 : vector<8xf32> to vector<8x1xf32>
    %c0_1 = arith.constant 0 : index
    %4 = memref.load %arg1[%c0_1] : memref<1xf32, #tpu.memory_space<smem>>
    %cst_2 = arith.constant 1.000000e-30 : f32
    %5 = vector.broadcast %cst_2 : f32 to vector<8x1xf32>
    %6 = arith.maximumf %3, %5 : vector<8x1xf32>
    %7 = math.rsqrt %6 : vector<8x1xf32>
    %8 = vector.broadcast %4 : f32 to vector<8x1xf32>
    %9 = arith.mulf %8, %7 : vector<8x1xf32>
    %10 = vector.broadcast %9 : vector<8x1xf32> to vector<8x512xf32>
    %11 = arith.mulf %0, %10 : vector<8x512xf32>
    %c0_3 = arith.constant 0 : index
    %c0_4 = arith.constant 0 : index
    %12 = vector.load %arg3[%c0_3, %c0_4] : memref<512x512xf32, #tpu.memory_space<vmem>>, vector<512x512xf32>
    %cst_5 = arith.constant dense<0.000000e+00> : vector<8x512xf32>
    %13 = tpu.matmul %11, %12, %cst_5 {dimension_numbers = #tpu.dot_dimension_numbers<[1], [0], [0], [1], [0, 0, 1, 1], [], []>} : vector<8x512xf32>, vector<512x512xf32>, vector<8x512xf32> -> vector<8x512xf32>
    %c0_6 = arith.constant 0 : index
    %c0_7 = arith.constant 0 : index
    %14 = vector.load %arg4[%c0_6, %c0_7] : memref<1x512xf32, #tpu.memory_space<vmem>>, vector<1x512xf32>
    %15 = vector.broadcast %14 : vector<1x512xf32> to vector<8x512xf32>
    %16 = arith.addf %13, %15 : vector<8x512xf32>
    %cst_8 = arith.constant dense<0xFF800000> : vector<8xf32>
    %17 = vector.multi_reduction <maximumf>, %16, %cst_8 [1] : vector<8x512xf32> to vector<8xf32>
    %18 = vector.shape_cast %17 : vector<8xf32> to vector<8x1xf32>
    %19 = vector.broadcast %18 : vector<8x1xf32> to vector<8x512xf32>
    %20 = arith.subf %16, %19 : vector<8x512xf32>
    %21 = math.exp %20 : vector<8x512xf32>
    %cst_9 = arith.constant dense<0.000000e+00> : vector<8xf32>
    %22 = vector.multi_reduction <add>, %21, %cst_9 [1] : vector<8x512xf32> to vector<8xf32>
    %23 = vector.shape_cast %22 : vector<8xf32> to vector<8x1xf32>
    %24 = vector.broadcast %23 : vector<8x1xf32> to vector<8x512xf32>
    %25 = arith.divf %21, %24 : vector<8x512xf32>
    %c0_10 = arith.constant 0 : index
    %c0_11 = arith.constant 0 : index
    %26 = vector.load %arg5[%c0_10, %c0_11] : memref<8x512xf32, #tpu.memory_space<vmem>>, vector<8x512xf32>
    tpu.vector_store %arg5[%c0_10, %c0_11], %25 {strides = array<i32>} : memref<8x512xf32, #tpu.memory_space<vmem>>, vector<8x512xf32>,
    return
  }
  func.func @transform_0(%arg0: i32) -> i32 {
    %c0_i32 = arith.constant 0 : i32
    %c0_i32_0 = arith.constant 0 : i32
    return %c0_i32 : i32
  }
  func.func @transform_1(%arg0: i32) -> (i32, i32) {
    %c0_i32 = arith.constant 0 : i32
    %c0_i32_0 = arith.constant 0 : i32
    return %arg0, %c0_i32 : i32, i32
  }
  func.func @transform_2(%arg0: i32) -> (i32, i32) {
    %c0_i32 = arith.constant 0 : i32
    %c0_i32_0 = arith.constant 0 : i32
    %c0_i32_1 = arith.constant 0 : i32
    return %c0_i32, %c0_i32_0 : i32, i32
  }
  func.func @transform_3(%arg0: i32) -> (i32, i32) {
    %c0_i32 = arith.constant 0 : i32
    %c0_i32_0 = arith.constant 0 : i32
    %c0_i32_1 = arith.constant 0 : i32
    return %c0_i32, %c0_i32_0 : i32, i32
  }
  func.func @transform_4(%arg0: i32) -> (i32, i32) {
    %c0_i32 = arith.constant 0 : i32
    %c0_i32_0 = arith.constant 0 : i32
    return %arg0, %c0_i32 : i32, i32
  }
}

</mosaic_0001>

<bundles_post_ra>
// kernel: tpu_custom_call.1
= control target key start
LH: loop header
LB: loop body
LE: loop exit
PB: predicated region body
PF: predicated region fallthrough
CT: control target
= control target key end

     0   :  { %10 = vsyncpa [#allocation4], 0  ;;  %s951_s0 = inlined_call_operand.<no memory space> [shape: f32[1], index: 0, kind: input, shape index: {}]   ;;  %s952_s1 = inlined_call_operand.hbm [shape: f32[8,512], index: 1, kind: input, shape index: {}]   ;;  %s953_s2 = inlined_call_operand.hbm [shape: f32[512,512], index: 2, kind: input, shape index: {}]   ;;  %s954_s3 = inlined_call_operand.hbm [shape: f32[1,512], index: 3, kind: input, shape index: {}]   ;;  %s955_s4 = inlined_call_operand.hbm [shape: f32[8,512], index: 4, kind: output, shape index: {}]  }
   0x1   :  { %11 = vsyncpa [#allocation7], 0  ;;  %s30_s17 = sshll.u32 %s953_s2, 4  ;;  %s31_s17 = int_to_ptr.hbm [resolvable:$true] %s30_s17 }
   0x2   :  { %12 = vsyncpa [#allocation5], 0  ;;  %s861_s18 = smov [#allocation6]   ;;  %s20_s22 = sshll.u32 %s952_s1, 4  ;;  %s21_s22 = int_to_ptr.hbm [resolvable:$true] %s20_s22 }
   0x3   :  { %s32_s19 = sshll.u32 %s861_s18, 4  ;;  %s862_s23 = smov 512   ;;  %s33_s19 = int_to_ptr.vmem [resolvable:$true] %s32_s19 }
   0x4   :  { %s863_s24 = smov 32   ;;  %s864_s25 = smov [#allocation3]  }
   0x5   :  { %38 = dma.hbm_to_vmem [thread:$0]  %s31_s17, 32768, %s33_s19, [#allocation7], %s862_s23, %s862_s23, %s863_s24  }
   0x6   :  { %s22_s26 = sshll.u32 %s864_s25, 4  ;;  %s44_s29 = sshll.u32 %s954_s3, 4  ;;  %s23_s26 = int_to_ptr.vmem [resolvable:$true] %s22_s26  ;;  %s45_s29 = int_to_ptr.hbm [resolvable:$true] %s44_s29 }
   0x7   :  { %25 = dma.hbm_to_vmem [thread:$0]  %s21_s22, 512, %s23_s26, [#allocation4]  }
   0x8   :  { %s865_s2 = smov [#allocation8]  }
   0x9   :  { %s46_s30 = sshll.u32 %s865_s2, 4  ;;  %s47_s30 = int_to_ptr.vmem [resolvable:$true] %s46_s30 }
   0xa   :  { %49 = dma.hbm_to_vmem [thread:$0]  %s45_s29, 64, %s47_s30, [#allocation7]  }
   0xb   :  { %855 = dma.done.wait [#allocation4], 512  }
   0xc   :  { %856 = vsyncadd [#allocation4], 4294966784 }
   0xd   :  { %857 = dma.done.wait [#allocation7], 32832  }
   0xe   :  { %858 = vsyncadd [#allocation7], 4294934464  ;;  %v901_v0 = vld [vmem:[#allocation3] sm:$0xff]  ;;  %v903_v1 = vld [vmem:[#allocation3 + $0x8] sm:$0xff]  ;;  %s730_s8 = sshll.u32 %s955_s4, 4  ;;  %s731_s8 = int_to_ptr.hbm [resolvable:$true] %s730_s8 }
   0xf   :  { %v905_v2 = vld [vmem:[#allocation3 + $0x10] sm:$0xff]  ;;  %v907_v3 = vld [vmem:[#allocation3 + $0x18] sm:$0xff]  ;;  %v66_v4 = vmul.f32 %v901_v0, %v901_v0  ;;  %v67_v5 = vmul.f32 %v903_v1, %v903_v1  ;;  %v153_v7 = vld [vmem:[#allocation6 + $0x1e0] sm:$0xff] }
  0x10   :  { %v68_v6 = vmul.f32 %v905_v2, %v905_v2  ;;  %v217_v8 = vld [vmem:[#allocation6 + $0x3e0] sm:$0xff]  ;;  %359 = vmatpush.msra.mxu0 %v153_v7  ;;  %v69_v12 = vmul.f32 %v907_v3, %v907_v3 }
  0x11   :  { %379 = vmatpush.msra.mxu1 %v217_v8  ;;  %v281_v9 = vld [vmem:[#allocation6 + $0x5e0] sm:$0xff]  ;;  %v70_v13 = vadd.f32 %v67_v5, %v66_v4 }
  0x12   :  { %v345_v10 = vld [vmem:[#allocation6 + $0x7e0] sm:$0xff]  ;;  %399 = vmatpush.msra.mxu2 %v281_v9 }
  0x13   :  { %v149_v11 = vld [vmem:[#allocation6 + $0x1c0] sm:$0xff]  ;;  %419 = vmatpush.msra.mxu3 %v345_v10  ;;  %v71_v20 = vadd.f32 %v70_v13, %v68_v6 }
  0x14   :  { %v213_v14 = vld [vmem:[#allocation6 + $0x3c0] sm:$0xff]  ;;  %360 = vmatpush.msra.mxu0 %v149_v11 }
  0x15   :  { %v277_v15 = vld [vmem:[#allocation6 + $0x5c0] sm:$0xff]  ;;  %380 = vmatpush.msra.mxu1 %v213_v14  ;;  %v72_v25 = vadd.f32 %v71_v20, %v69_v12  ;;  %v214_v20 = vld [vmem:[#allocation6 + $0x3c8] sm:$0xff] }
  0x16   :  { %v341_v16 = vld [vmem:[#allocation6 + $0x7c0] sm:$0xff]  ;;  %400 = vmatpush.msra.mxu2 %v277_v15  ;;  %v154_v15 = vld [vmem:[#allocation6 + $0x1e8] sm:$0xff] }
  0x17   :  { %v145_v17 = vld [vmem:[#allocation6 + $0x1a0] sm:$0xff]  ;;  %420 = vmatpush.msra.mxu3 %v341_v16  ;;  %73 = vadd.xlane.f32.xlu0 %v72_v25  ;;  %v218_v16 = vld [vmem:[#allocation6 + $0x3e8] sm:$0xff] }
  0x18   :  { %v209_v18 = vld [vmem:[#allocation6 + $0x3a0] sm:$0xff]  ;;  %361 = vmatpush.msra.mxu0 %v145_v17  ;;  %v282_v17 = vld [vmem:[#allocation6 + $0x5e8] sm:$0xff] }
  0x19   :  { %v273_v19 = vld [vmem:[#allocation6 + $0x5a0] sm:$0xff]  ;;  %381 = vmatpush.msra.mxu1 %v209_v18  ;;  %v346_v18 = vld [vmem:[#allocation6 + $0x7e8] sm:$0xff] }
  0x1a   :  { %v337_v21 = vld [vmem:[#allocation6 + $0x7a0] sm:$0xff]  ;;  %401 = vmatpush.msra.mxu2 %v273_v19  ;;  %v150_v19 = vld [vmem:[#allocation6 + $0x1c8] sm:$0xff] }
  0x1b   :  { %v141_v22 = vld [vmem:[#allocation6 + $0x180] sm:$0xff]  ;;  %421 = vmatpush.msra.mxu3 %v337_v21  ;;  %v278_v21 = vld [vmem:[#allocation6 + $0x5c8] sm:$0xff] }
  0x1c   :  { %v205_v23 = vld [vmem:[#allocation6 + $0x380] sm:$0xff]  ;;  %362 = vmatpush.msra.mxu0 %v141_v22  ;;  %v342_v22 = vld [vmem:[#allocation6 + $0x7c8] sm:$0xff] }
  0x1d   :  { %v269_v24 = vld [vmem:[#allocation6 + $0x580] sm:$0xff]  ;;  %382 = vmatpush.msra.mxu1 %v205_v23  ;;  %v146_v23 = vld [vmem:[#allocation6 + $0x1a8] sm:$0xff] }
  0x1e   :  { %v333_v26 = vld [vmem:[#allocation6 + $0x780] sm:$0xff]  ;;  %402 = vmatpush.msra.mxu2 %v269_v24  ;;  %v210_v24 = vld [vmem:[#allocation6 + $0x3a8] sm:$0xff] }
  0x1f   :  { %v137_v27 = vld [vmem:[#allocation6 + $0x160] sm:$0xff]  ;;  %422 = vmatpush.msra.mxu3 %v333_v26  ;;  %v274_v25 = vld [vmem:[#allocation6 + $0x5a8] sm:$0xff] }
  0x20   :  { %v201_v28 = vld [vmem:[#allocation6 + $0x360] sm:$0xff]  ;;  %363 = vmatpush.msra.mxu0 %v137_v27  ;;  %v338_v26 = vld [vmem:[#allocation6 + $0x7a8] sm:$0xff] }
  0x21   :  { %v265_v29 = vld [vmem:[#allocation6 + $0x560] sm:$0xff]  ;;  %383 = vmatpush.msra.mxu1 %v201_v28  ;;  %v142_v27 = vld [vmem:[#allocation6 + $0x188] sm:$0xff] }
  0x22   :  { %v329_v30 = vld [vmem:[#allocation6 + $0x760] sm:$0xff]  ;;  %403 = vmatpush.msra.mxu2 %v265_v29  ;;  %v206_v28 = vld [vmem:[#allocation6 + $0x388] sm:$0xff] }
  0x23   :  { %v133_v31 = vld [vmem:[#allocation6 + $0x140] sm:$0xff]  ;;  %423 = vmatpush.msra.mxu3 %v329_v30  ;;  %v270_v29 = vld [vmem:[#allocation6 + $0x588] sm:$0xff] }
  0x24   :  { %v197_v32 = vld [vmem:[#allocation6 + $0x340] sm:$0xff]  ;;  %364 = vmatpush.msra.mxu0 %v133_v31  ;;  %v334_v30 = vld [vmem:[#allocation6 + $0x788] sm:$0xff] }
  0x25   :  { %v261_v33 = vld [vmem:[#allocation6 + $0x540] sm:$0xff]  ;;  %384 = vmatpush.msra.mxu1 %v197_v32  ;;  %v138_v31 = vld [vmem:[#allocation6 + $0x168] sm:$0xff] }
  0x26   :  { %v325_v34 = vld [vmem:[#allocation6 + $0x740] sm:$0xff]  ;;  %404 = vmatpush.msra.mxu2 %v261_v33  ;;  %v202_v32 = vld [vmem:[#allocation6 + $0x368] sm:$0xff] }
  0x27   :  { %v129_v35 = vld [vmem:[#allocation6 + $0x120] sm:$0xff]  ;;  %424 = vmatpush.msra.mxu3 %v325_v34  ;;  %v266_v33 = vld [vmem:[#allocation6 + $0x568] sm:$0xff] }
  0x28   :  { %v193_v36 = vld [vmem:[#allocation6 + $0x320] sm:$0xff]  ;;  %365 = vmatpush.msra.mxu0 %v129_v35  ;;  %v330_v34 = vld [vmem:[#allocation6 + $0x768] sm:$0xff] }
  0x29   :  { %v257_v37 = vld [vmem:[#allocation6 + $0x520] sm:$0xff]  ;;  %385 = vmatpush.msra.mxu1 %v193_v36  ;;  %v134_v35 = vld [vmem:[#allocation6 + $0x148] sm:$0xff] }
  0x2a   :  { %v321_v38 = vld [vmem:[#allocation6 + $0x720] sm:$0xff]  ;;  %405 = vmatpush.msra.mxu2 %v257_v37  ;;  %v198_v36 = vld [vmem:[#allocation6 + $0x348] sm:$0xff] }
  0x2b   :  { %v125_v39 = vld [vmem:[#allocation6 + $0x100] sm:$0xff]  ;;  %425 = vmatpush.msra.mxu3 %v321_v38  ;;  %v262_v37 = vld [vmem:[#allocation6 + $0x548] sm:$0xff] }
  0x2c   :  { %v189_v40 = vld [vmem:[#allocation6 + $0x300] sm:$0xff]  ;;  %366 = vmatpush.msra.mxu0 %v125_v39  ;;  %v326_v38 = vld [vmem:[#allocation6 + $0x748] sm:$0xff] }
  0x2d   :  { %v253_v41 = vld [vmem:[#allocation6 + $0x500] sm:$0xff]  ;;  %386 = vmatpush.msra.mxu1 %v189_v40  ;;  %v130_v39 = vld [vmem:[#allocation6 + $0x128] sm:$0xff] }
  0x2e   :  { %v317_v42 = vld [vmem:[#allocation6 + $0x700] sm:$0xff]  ;;  %406 = vmatpush.msra.mxu2 %v253_v41  ;;  %v194_v40 = vld [vmem:[#allocation6 + $0x328] sm:$0xff] }
  0x2f   :  { %v121_v43 = vld [vmem:[#allocation6 + $0xe0] sm:$0xff]  ;;  %426 = vmatpush.msra.mxu3 %v317_v42  ;;  %v258_v41 = vld [vmem:[#allocation6 + $0x528] sm:$0xff] }
  0x30   :  { %v185_v44 = vld [vmem:[#allocation6 + $0x2e0] sm:$0xff]  ;;  %367 = vmatpush.msra.mxu0 %v121_v43  ;;  %v322_v42 = vld [vmem:[#allocation6 + $0x728] sm:$0xff] }
  0x31   :  { %v249_v45 = vld [vmem:[#allocation6 + $0x4e0] sm:$0xff]  ;;  %387 = vmatpush.msra.mxu1 %v185_v44  ;;  %v126_v43 = vld [vmem:[#allocation6 + $0x108] sm:$0xff] }
  0x32   :  { %v313_v46 = vld [vmem:[#allocation6 + $0x6e0] sm:$0xff]  ;;  %407 = vmatpush.msra.mxu2 %v249_v45  ;;  %v190_v44 = vld [vmem:[#allocation6 + $0x308] sm:$0xff] }
  0x33   :  { %v117_v47 = vld [vmem:[#allocation6 + $0xc0] sm:$0xff]  ;;  %427 = vmatpush.msra.mxu3 %v313_v46  ;;  %v254_v45 = vld [vmem:[#allocation6 + $0x508] sm:$0xff] }
  0x34   :  { %v181_v48 = vld [vmem:[#allocation6 + $0x2c0] sm:$0xff]  ;;  %368 = vmatpush.msra.mxu0 %v117_v47  ;;  %v318_v46 = vld [vmem:[#allocation6 + $0x708] sm:$0xff] }
  0x35   :  { %v245_v49 = vld [vmem:[#allocation6 + $0x4c0] sm:$0xff]  ;;  %388 = vmatpush.msra.mxu1 %v181_v48  ;;  %v122_v47 = vld [vmem:[#allocation6 + $0xe8] sm:$0xff] }
  0x36   :  { %v309_v50 = vld [vmem:[#allocation6 + $0x6c0] sm:$0xff]  ;;  %408 = vmatpush.msra.mxu2 %v245_v49  ;;  %v186_v48 = vld [vmem:[#allocation6 + $0x2e8] sm:$0xff] }
  0x37   :  { %v113_v51 = vld [vmem:[#allocation6 + $0xa0] sm:$0xff]  ;;  %428 = vmatpush.msra.mxu3 %v309_v50  ;;  %v250_v49 = vld [vmem:[#allocation6 + $0x4e8] sm:$0xff] }
  0x38   :  { %v177_v52 = vld [vmem:[#allocation6 + $0x2a0] sm:$0xff]  ;;  %369 = vmatpush.msra.mxu0 %v113_v51  ;;  %v314_v50 = vld [vmem:[#allocation6 + $0x6e8] sm:$0xff] }
  0x39   :  { %v241_v53 = vld [vmem:[#allocation6 + $0x4a0] sm:$0xff]  ;;  %389 = vmatpush.msra.mxu1 %v177_v52  ;;  %v118_v51 = vld [vmem:[#allocation6 + $0xc8] sm:$0xff] }
  0x3a   :  { %v305_v54 = vld [vmem:[#allocation6 + $0x6a0] sm:$0xff]  ;;  %409 = vmatpush.msra.mxu2 %v241_v53  ;;  %v182_v52 = vld [vmem:[#allocation6 + $0x2c8] sm:$0xff] }
  0x3b   :  { %v109_v55 = vld [vmem:[#allocation6 + $0x80] sm:$0xff]  ;;  %429 = vmatpush.msra.mxu3 %v305_v54  ;;  %v246_v53 = vld [vmem:[#allocation6 + $0x4c8] sm:$0xff] }
  0x3c   :  { %v173_v56 = vld [vmem:[#allocation6 + $0x280] sm:$0xff]  ;;  %370 = vmatpush.msra.mxu0 %v109_v55  ;;  %v310_v54 = vld [vmem:[#allocation6 + $0x6c8] sm:$0xff] }
  0x3d   :  { %v237_v57 = vld [vmem:[#allocation6 + $0x480] sm:$0xff]  ;;  %390 = vmatpush.msra.mxu1 %v173_v56  ;;  %v114_v55 = vld [vmem:[#allocation6 + $0xa8] sm:$0xff] }
  0x3e   :  { %v301_v58 = vld [vmem:[#allocation6 + $0x680] sm:$0xff]  ;;  %410 = vmatpush.msra.mxu2 %v237_v57  ;;  %v178_v56 = vld [vmem:[#allocation6 + $0x2a8] sm:$0xff] }
  0x3f   :  { %v105_v59 = vld [vmem:[#allocation6 + $0x60] sm:$0xff]  ;;  %430 = vmatpush.msra.mxu3 %v301_v58  ;;  %v242_v57 = vld [vmem:[#allocation6 + $0x4a8] sm:$0xff] }
  0x40   :  { %v169_v60 = vld [vmem:[#allocation6 + $0x260] sm:$0xff]  ;;  %371 = vmatpush.msra.mxu0 %v105_v59  ;;  %v306_v58 = vld [vmem:[#allocation6 + $0x6a8] sm:$0xff] }
  0x41   :  { %v233_v61 = vld [vmem:[#allocation6 + $0x460] sm:$0xff]  ;;  %391 = vmatpush.msra.mxu1 %v169_v60  ;;  %v110_v59 = vld [vmem:[#allocation6 + $0x88] sm:$0xff] }
  0x42   :  { %v297_v62 = vld [vmem:[#allocation6 + $0x660] sm:$0xff]  ;;  %411 = vmatpush.msra.mxu2 %v233_v61  ;;  %v174_v60 = vld [vmem:[#allocation6 + $0x288] sm:$0xff] }
  0x43   :  { %v101_v63 = vld [vmem:[#allocation6 + $0x40] sm:$0xff]  ;;  %431 = vmatpush.msra.mxu3 %v297_v62  ;;  %v238_v61 = vld [vmem:[#allocation6 + $0x488] sm:$0xff] }
  0x44   :  { %v165_v4 = vld [vmem:[#allocation6 + $0x240] sm:$0xff]  ;;  %372 = vmatpush.msra.mxu0 %v101_v63  ;;  %v302_v62 = vld [vmem:[#allocation6 + $0x688] sm:$0xff] }
  0x45   :  { %v229_v5 = vld [vmem:[#allocation6 + $0x440] sm:$0xff]  ;;  %392 = vmatpush.msra.mxu1 %v165_v4  ;;  %v106_v63 = vld [vmem:[#allocation6 + $0x68] sm:$0xff] }
  0x46   :  { %v293_v6 = vld [vmem:[#allocation6 + $0x640] sm:$0xff]  ;;  %412 = vmatpush.msra.mxu2 %v229_v5  ;;  %v170_v4 = vld [vmem:[#allocation6 + $0x268] sm:$0xff] }
  0x47   :  { %v97_v7 = vld [vmem:[#allocation6 + $0x20] sm:$0xff]  ;;  %432 = vmatpush.msra.mxu3 %v293_v6  ;;  %v234_v5 = vld [vmem:[#allocation6 + $0x468] sm:$0xff] }
  0x48   :  { %v161_v8 = vld [vmem:[#allocation6 + $0x220] sm:$0xff]  ;;  %373 = vmatpush.msra.mxu0 %v97_v7  ;;  %v298_v6 = vld [vmem:[#allocation6 + $0x668] sm:$0xff] }
  0x49   :  { %v225_v9 = vld [vmem:[#allocation6 + $0x420] sm:$0xff]  ;;  %393 = vmatpush.msra.mxu1 %v161_v8  ;;  %v102_v7 = vld [vmem:[#allocation6 + $0x48] sm:$0xff] }
  0x4a   :  { %v289_v10 = vld [vmem:[#allocation6 + $0x620] sm:$0xff]  ;;  %413 = vmatpush.msra.mxu2 %v225_v9  ;;  %v166_v8 = vld [vmem:[#allocation6 + $0x248] sm:$0xff] }
  0x4b   :  { %v93_v11 = vld [vmem:[#allocation6] sm:$0xff]  ;;  %433 = vmatpush.msra.mxu3 %v289_v10  ;;  %v230_v9 = vld [vmem:[#allocation6 + $0x448] sm:$0xff] }
  0x4c   :  { %v157_v12 = vld [vmem:[#allocation6 + $0x200] sm:$0xff]  ;;  %374 = vmatpush.msra.mxu0 %v93_v11  ;;  %v294_v10 = vld [vmem:[#allocation6 + $0x648] sm:$0xff] }
  0x4d   :  { %v221_v13 = vld [vmem:[#allocation6 + $0x400] sm:$0xff]  ;;  %394 = vmatpush.msra.mxu1 %v157_v12  ;;  %v98_v11 = vld [vmem:[#allocation6 + $0x28] sm:$0xff] }
  0x4e   :  { %v285_v14 = vld [vmem:[#allocation6 + $0x600] sm:$0xff]  ;;  %414 = vmatpush.msra.mxu2 %v221_v13  ;;  %439 = vmatpush.msrb.mxu0 %v154_v15  ;;  %v162_v12 = vld [vmem:[#allocation6 + $0x228] sm:$0xff] }
  0x4f   :  { %434 = vmatpush.msra.mxu3 %v285_v14  ;;  %459 = vmatpush.msrb.mxu1 %v218_v16  ;;  %v226_v13 = vld [vmem:[#allocation6 + $0x428] sm:$0xff] }
  0x50   :  { %479 = vmatpush.msrb.mxu2 %v282_v17  ;;  %440 = vmatpush.msrb.mxu0 %v150_v19  ;;  %v290_v14 = vld [vmem:[#allocation6 + $0x628] sm:$0xff] }
  0x51   :  { %499 = vmatpush.msrb.mxu3 %v346_v18  ;;  %460 = vmatpush.msrb.mxu1 %v214_v20  ;;  %v94_v15 = vld [vmem:[#allocation6 + $0x8] sm:$0xff] }
  0x52   :  { %480 = vmatpush.msrb.mxu2 %v278_v21  ;;  %441 = vmatpush.msrb.mxu0 %v146_v23  ;;  %v158_v16 = vld [vmem:[#allocation6 + $0x208] sm:$0xff] }
  0x53   :  { %500 = vmatpush.msrb.mxu3 %v342_v22  ;;  %461 = vmatpush.msrb.mxu1 %v210_v24  ;;  %v222_v17 = vld [vmem:[#allocation6 + $0x408] sm:$0xff] }
  0x54   :  { %481 = vmatpush.msrb.mxu2 %v274_v25  ;;  %442 = vmatpush.msrb.mxu0 %v142_v27  ;;  %v286_v18 = vld [vmem:[#allocation6 + $0x608] sm:$0xff] }
  0x55   :  { %501 = vmatpush.msrb.mxu3 %v338_v26  ;;  %462 = vmatpush.msrb.mxu1 %v206_v28  ;;  %v87_v26 = vstv %s951_s0  ;;  %s866_s0 = smov [#allocation9]  }
  0x56   :  { %482 = vmatpush.msrb.mxu2 %v270_v29  ;;  %443 = vmatpush.msrb.mxu0 %v138_v31  ;;  %s728_s5 = sshll.u32 %s866_s0, 4  ;;  %s729_s5 = int_to_ptr.vmem [resolvable:$true] %s728_s5 }
  0x57   :  { %502 = vmatpush.msrb.mxu3 %v334_v30  ;;  %463 = vmatpush.msrb.mxu1 %v202_v32 }
  0x58   :  { %483 = vmatpush.msrb.mxu2 %v266_v33  ;;  %444 = vmatpush.msrb.mxu0 %v134_v35  ;;  %v219_v35 = vld [vmem:[#allocation6 + $0x3f0] sm:$0xff] }
  0x59   :  { %503 = vmatpush.msrb.mxu3 %v330_v34  ;;  %464 = vmatpush.msrb.mxu1 %v198_v36  ;;  %v155_v34 = vld [vmem:[#allocation6 + $0x1f0] sm:$0xff] }
  0x5a   :  { %484 = vmatpush.msrb.mxu2 %v262_v37  ;;  %445 = vmatpush.msrb.mxu0 %v130_v39  ;;  %v283_v36 = vld [vmem:[#allocation6 + $0x5f0] sm:$0xff] }
  0x5b   :  { %504 = vmatpush.msrb.mxu3 %v326_v38  ;;  %465 = vmatpush.msrb.mxu1 %v194_v40  ;;  %v347_v37 = vld [vmem:[#allocation6 + $0x7f0] sm:$0xff] }
  0x5c   :  { %485 = vmatpush.msrb.mxu2 %v258_v41  ;;  %446 = vmatpush.msrb.mxu0 %v126_v43  ;;  %v343_v38 = vld [vmem:[#allocation6 + $0x7d0] sm:$0xff] }
  0x5d   :  { %505 = vmatpush.msrb.mxu3 %v322_v42  ;;  %466 = vmatpush.msrb.mxu1 %v190_v44  ;;  %v211_v39 = vld [vmem:[#allocation6 + $0x3b0] sm:$0xff] }
  0x5e   :  { %486 = vmatpush.msrb.mxu2 %v254_v45  ;;  %447 = vmatpush.msrb.mxu0 %v122_v47  ;;  %v275_v40 = vld [vmem:[#allocation6 + $0x5b0] sm:$0xff] }
  0x5f   :  { %506 = vmatpush.msrb.mxu3 %v318_v46  ;;  %467 = vmatpush.msrb.mxu1 %v186_v48  ;;  %v339_v41 = vld [vmem:[#allocation6 + $0x7b0] sm:$0xff] }
  0x60   :  { %487 = vmatpush.msrb.mxu2 %v250_v49  ;;  %448 = vmatpush.msrb.mxu0 %v118_v51  ;;  %v143_v42 = vld [vmem:[#allocation6 + $0x190] sm:$0xff] }
  0x61   :  { %507 = vmatpush.msrb.mxu3 %v314_v50  ;;  %468 = vmatpush.msrb.mxu1 %v182_v52  ;;  %v207_v43 = vld [vmem:[#allocation6 + $0x390] sm:$0xff] }
  0x62   :  { %488 = vmatpush.msrb.mxu2 %v246_v53  ;;  %449 = vmatpush.msrb.mxu0 %v114_v55  ;;  %v271_v44 = vld [vmem:[#allocation6 + $0x590] sm:$0xff] }
  0x63   :  { %508 = vmatpush.msrb.mxu3 %v310_v54  ;;  %469 = vmatpush.msrb.mxu1 %v178_v56  ;;  %v335_v45 = vld [vmem:[#allocation6 + $0x790] sm:$0xff] }
  0x64   :  { %489 = vmatpush.msrb.mxu2 %v242_v57  ;;  %450 = vmatpush.msrb.mxu0 %v110_v59  ;;  %v139_v46 = vld [vmem:[#allocation6 + $0x170] sm:$0xff] }
  0x65   :  { %509 = vmatpush.msrb.mxu3 %v306_v58  ;;  %470 = vmatpush.msrb.mxu1 %v174_v60  ;;  %v203_v47 = vld [vmem:[#allocation6 + $0x370] sm:$0xff] }
  0x66   :  { %490 = vmatpush.msrb.mxu2 %v238_v61  ;;  %451 = vmatpush.msrb.mxu0 %v106_v63  ;;  %v267_v48 = vld [vmem:[#allocation6 + $0x570] sm:$0xff] }
  0x67   :  { %510 = vmatpush.msrb.mxu3 %v302_v62  ;;  %471 = vmatpush.msrb.mxu1 %v170_v4  ;;  %v331_v49 = vld [vmem:[#allocation6 + $0x770] sm:$0xff] }
  0x68   :  { %491 = vmatpush.msrb.mxu2 %v234_v5  ;;  %452 = vmatpush.msrb.mxu0 %v102_v7  ;;  %v135_v50 = vld [vmem:[#allocation6 + $0x150] sm:$0xff] }
  0x69   :  { %511 = vmatpush.msrb.mxu3 %v298_v6  ;;  %472 = vmatpush.msrb.mxu1 %v166_v8  ;;  %v199_v51 = vld [vmem:[#allocation6 + $0x350] sm:$0xff] }
  0x6a   :  { %492 = vmatpush.msrb.mxu2 %v230_v9  ;;  %453 = vmatpush.msrb.mxu0 %v98_v11  ;;  %v263_v52 = vld [vmem:[#allocation6 + $0x550] sm:$0xff] }
  0x6b   :  { %512 = vmatpush.msrb.mxu3 %v294_v10  ;;  %473 = vmatpush.msrb.mxu1 %v162_v12  ;;  %v327_v53 = vld [vmem:[#allocation6 + $0x750] sm:$0xff] }
  0x6c   :  { %493 = vmatpush.msrb.mxu2 %v226_v13  ;;  %454 = vmatpush.msrb.mxu0 %v94_v15  ;;  %v131_v54 = vld [vmem:[#allocation6 + $0x130] sm:$0xff] }
  0x6d   :  { %513 = vmatpush.msrb.mxu3 %v290_v14  ;;  %474 = vmatpush.msrb.mxu1 %v158_v16  ;;  %v195_v55 = vld [vmem:[#allocation6 + $0x330] sm:$0xff] }
  0x6e   :  { %494 = vmatpush.msrb.mxu2 %v222_v17  ;;  %v259_v56 = vld [vmem:[#allocation6 + $0x530] sm:$0xff] }
  0x6f   :  { %514 = vmatpush.msrb.mxu3 %v286_v18  ;;  %v323_v57 = vld [vmem:[#allocation6 + $0x730] sm:$0xff] }
  0x70   :  { %v127_v58 = vld [vmem:[#allocation6 + $0x110] sm:$0xff] }
  0x71   :  { %v191_v59 = vld [vmem:[#allocation6 + $0x310] sm:$0xff] }
  0x72   :  { %v255_v60 = vld [vmem:[#allocation6 + $0x510] sm:$0xff] }
  0x73   :  { %v319_v61 = vld [vmem:[#allocation6 + $0x710] sm:$0xff] }
  0x74   :  { %v123_v62 = vld [vmem:[#allocation6 + $0xf0] sm:$0xff] }
  0x75   :  { %v187_v63 = vld [vmem:[#allocation6 + $0x2f0] sm:$0xff] }
  0x76   :  { %v251_v4 = vld [vmem:[#allocation6 + $0x4f0] sm:$0xff] }
  0x77   :  { %v315_v5 = vld [vmem:[#allocation6 + $0x6f0] sm:$0xff] }
  0x78   :  { %v119_v6 = vld [vmem:[#allocation6 + $0xd0] sm:$0xff] }
  0x79   :  { %v183_v7 = vld [vmem:[#allocation6 + $0x2d0] sm:$0xff] }
  0x7a   :  { %v247_v8 = vld [vmem:[#allocation6 + $0x4d0] sm:$0xff] }
  0x7b   :  { %v311_v9 = vld [vmem:[#allocation6 + $0x6d0] sm:$0xff] }
  0x7c   :  { %v115_v10 = vld [vmem:[#allocation6 + $0xb0] sm:$0xff] }
  0x7d   :  { %v179_v11 = vld [vmem:[#allocation6 + $0x2b0] sm:$0xff] }
  0x7e   :  { %v243_v12 = vld [vmem:[#allocation6 + $0x4b0] sm:$0xff] }
  0x7f   :  { %v307_v13 = vld [vmem:[#allocation6 + $0x6b0] sm:$0xff] }
  0x80   :  { %v111_v14 = vld [vmem:[#allocation6 + $0x90] sm:$0xff] }
  0x81   :  { %v175_v15 = vld [vmem:[#allocation6 + $0x290] sm:$0xff] }
  0x82   :  { %v239_v16 = vld [vmem:[#allocation6 + $0x490] sm:$0xff] }
  0x83   :  { %v303_v17 = vld [vmem:[#allocation6 + $0x690] sm:$0xff] }
  0x84   :  { %v107_v18 = vld [vmem:[#allocation6 + $0x70] sm:$0xff] }
  0x8a   :  { %v74_v19 = vpop.xlane.xlu0 %73 }
  0x8b   :  { %v76_v20 = vmax.f32 %v74_v19, 1e-30  ;;  %v171_v19 = vld [vmem:[#allocation6 + $0x270] sm:$0xff] }
  0x8d   :  { %747 = vrsqrt.f32 %v76_v20  ;;  %vm83_vm1 = vweird.f32 %v76_v20 }
  0x93   :  { %v748_v21 = vpop.eup %747 }
  0x94   :  { %v78_v22 = vmul.f32 %v748_v21, %v76_v20  ;;  %vm84_vm0 = vweird.f32 %v748_v21  ;;  %v235_v20 = vld [vmem:[#allocation6 + $0x470] sm:$0xff] }
  0x95   :  { %vm85_vm2 = vmor %vm83_vm1, %vm84_vm0 }
  0x96   :  { %v79_v23 = vmul.f32 %v748_v21, %v78_v22  ;;  %v103_v22 = vld [vmem:[#allocation6 + $0x50] sm:$0xff] }
  0x98   :  { %v80_v24 = vmul.f32 0.5, %v79_v23  ;;  %v167_v23 = vld [vmem:[#allocation6 + $0x250] sm:$0xff] }
  0x9a   :  { %v81_v25 = vsub.f32 1.5, %v80_v24  ;;  %v231_v24 = vld [vmem:[#allocation6 + $0x450] sm:$0xff] }
  0x9c   :  { %v82_v27 = vmul.f32 %v748_v21, %v81_v25  ;;  %v295_v25 = vld [vmem:[#allocation6 + $0x650] sm:$0xff] }
  0x9e   :  { %v86_v28 = vsel %vm85_vm2, %v748_v21, %v82_v27  ;;  %v299_v21 = vld [vmem:[#allocation6 + $0x670] sm:$0xff] }
  0x9f   :  { %v88_v29 = vmul.f32 %v87_v26, %v86_v28  ;;  %v99_v26 = vld [vmem:[#allocation6 + $0x30] sm:$0xff] }
  0xa0   :  { %v163_v27 = vld [vmem:[#allocation6 + $0x230] sm:$0xff] }
  0xa1   :  { %v921_v30 = vmul.f32 %v88_v29, %v901_v0  ;;  %v924_v31 = vmul.f32 %v88_v29, %v903_v1  ;;  %v927_v32 = vmul.f32 %v88_v29, %v905_v2  ;;  %v930_v33 = vmul.f32 %v88_v29, %v907_v3  ;;  %v151_v0 = vld [vmem:[#allocation6 + $0x1d0] sm:$0xff] }
  0xa2   :  { %v215_v1 = vld [vmem:[#allocation6 + $0x3d0] sm:$0xff] }
  0xa3   :  { %375 = vmatmul.f32.vlgmr.msra.gmra.mxu0 %v921_v30  ;;  %395 = vmatmul.f32.vlgmr.msra.gmra.mxu1 %v924_v31  ;;  %v279_v2 = vld [vmem:[#allocation6 + $0x5d0] sm:$0xff] }
  0xa4   :  { %415 = vmatmul.f32.vlgmr.msra.gmra.mxu2 %v927_v32  ;;  %435 = vmatmul.f32.vlgmr.msra.gmra.mxu3 %v930_v33  ;;  %v147_v3 = vld [vmem:[#allocation6 + $0x1b0] sm:$0xff] }
  0xa5   :  { %519 = vmatpush.msra.mxu0 %v155_v34  ;;  %539 = vmatpush.msra.mxu1 %v219_v35  ;;  %v227_v28 = vld [vmem:[#allocation6 + $0x430] sm:$0xff] }
  0xa6   :  { %559 = vmatpush.msra.mxu2 %v283_v36  ;;  %579 = vmatpush.msra.mxu3 %v347_v37  ;;  %v291_v29 = vld [vmem:[#allocation6 + $0x630] sm:$0xff] }
  0xa7   :  { %520 = vmatpush.msra.mxu0 %v151_v0  ;;  %540 = vmatpush.msra.mxu1 %v215_v1  ;;  %v95_v34 = vld [vmem:[#allocation6 + $0x10] sm:$0xff]  ;;  %v156_v0 = vld [vmem:[#allocation6 + $0x1f8] sm:$0xff] }
  0xa8   :  { %560 = vmatpush.msra.mxu2 %v279_v2  ;;  %580 = vmatpush.msra.mxu3 %v343_v38  ;;  %v159_v35 = vld [vmem:[#allocation6 + $0x210] sm:$0xff]  ;;  %v220_v1 = vld [vmem:[#allocation6 + $0x3f8] sm:$0xff] }
  0xa9   :  { %521 = vmatpush.msra.mxu0 %v147_v3  ;;  %541 = vmatpush.msra.mxu1 %v211_v39  ;;  %v223_v36 = vld [vmem:[#allocation6 + $0x410] sm:$0xff]  ;;  %v284_v2 = vld [vmem:[#allocation6 + $0x5f8] sm:$0xff] }
  0xaa   :  { %561 = vmatpush.msra.mxu2 %v275_v40  ;;  %581 = vmatpush.msra.mxu3 %v339_v41  ;;  %v287_v37 = vld [vmem:[#allocation6 + $0x610] sm:$0xff]  ;;  %v348_v38 = vld [vmem:[#allocation6 + $0x7f8] sm:$0xff] }
  0xab   :  { %522 = vmatpush.msra.mxu0 %v143_v42  ;;  %542 = vmatpush.msra.mxu1 %v207_v43  ;;  %v152_v3 = vld [vmem:[#allocation6 + $0x1d8] sm:$0xff] }
  0xac   :  { %562 = vmatpush.msra.mxu2 %v271_v44  ;;  %582 = vmatpush.msra.mxu3 %v335_v45  ;;  %v216_v39 = vld [vmem:[#allocation6 + $0x3d8] sm:$0xff] }
  0xad   :  { %455 = vmatmul.f32.vlgmr.msrb.gmra.mxu0 %v921_v30  ;;  %475 = vmatmul.f32.vlgmr.msrb.gmra.mxu1 %v924_v31  ;;  %v280_v40 = vld [vmem:[#allocation6 + $0x5d8] sm:$0xff] }
  0xae   :  { %495 = vmatmul.f32.vlgmr.msrb.gmra.mxu2 %v927_v32  ;;  %515 = vmatmul.f32.vlgmr.msrb.gmra.mxu3 %v930_v33  ;;  %v344_v41 = vld [vmem:[#allocation6 + $0x7d8] sm:$0xff] }
  0xaf   :  { %523 = vmatpush.msra.mxu0 %v139_v46  ;;  %543 = vmatpush.msra.mxu1 %v203_v47  ;;  %v148_v42 = vld [vmem:[#allocation6 + $0x1b8] sm:$0xff] }
  0xb0   :  { %563 = vmatpush.msra.mxu2 %v267_v48  ;;  %583 = vmatpush.msra.mxu3 %v331_v49  ;;  %v212_v43 = vld [vmem:[#allocation6 + $0x3b8] sm:$0xff] }
  0xb1   :  { %524 = vmatpush.msra.mxu0 %v135_v50  ;;  %544 = vmatpush.msra.mxu1 %v199_v51  ;;  %v276_v44 = vld [vmem:[#allocation6 + $0x5b8] sm:$0xff] }
  0xb2   :  { %564 = vmatpush.msra.mxu2 %v263_v52  ;;  %584 = vmatpush.msra.mxu3 %v327_v53  ;;  %v340_v45 = vld [vmem:[#allocation6 + $0x7b8] sm:$0xff] }
  0xb3   :  { %525 = vmatpush.msra.mxu0 %v131_v54  ;;  %545 = vmatpush.msra.mxu1 %v195_v55  ;;  %v144_v46 = vld [vmem:[#allocation6 + $0x198] sm:$0xff] }
  0xb4   :  { %565 = vmatpush.msra.mxu2 %v259_v56  ;;  %585 = vmatpush.msra.mxu3 %v323_v57  ;;  %v208_v47 = vld [vmem:[#allocation6 + $0x398] sm:$0xff] }
  0xb5   :  { %526 = vmatpush.msra.mxu0 %v127_v58  ;;  %546 = vmatpush.msra.mxu1 %v191_v59  ;;  %v272_v48 = vld [vmem:[#allocation6 + $0x598] sm:$0xff] }
  0xb6   :  { %566 = vmatpush.msra.mxu2 %v255_v60  ;;  %586 = vmatpush.msra.mxu3 %v319_v61  ;;  %v336_v49 = vld [vmem:[#allocation6 + $0x798] sm:$0xff] }
  0xb7   :  { %527 = vmatpush.msra.mxu0 %v123_v62  ;;  %547 = vmatpush.msra.mxu1 %v187_v63  ;;  %v140_v50 = vld [vmem:[#allocation6 + $0x178] sm:$0xff] }
  0xb8   :  { %567 = vmatpush.msra.mxu2 %v251_v4  ;;  %587 = vmatpush.msra.mxu3 %v315_v5  ;;  %v204_v51 = vld [vmem:[#allocation6 + $0x378] sm:$0xff] }
  0xb9   :  { %528 = vmatpush.msra.mxu0 %v119_v6  ;;  %548 = vmatpush.msra.mxu1 %v183_v7  ;;  %v268_v52 = vld [vmem:[#allocation6 + $0x578] sm:$0xff] }
  0xba   :  { %568 = vmatpush.msra.mxu2 %v247_v8  ;;  %588 = vmatpush.msra.mxu3 %v311_v9  ;;  %v332_v53 = vld [vmem:[#allocation6 + $0x778] sm:$0xff] }
  0xbb   :  { %529 = vmatpush.msra.mxu0 %v115_v10  ;;  %549 = vmatpush.msra.mxu1 %v179_v11  ;;  %v136_v54 = vld [vmem:[#allocation6 + $0x158] sm:$0xff] }
  0xbc   :  { %569 = vmatpush.msra.mxu2 %v243_v12  ;;  %589 = vmatpush.msra.mxu3 %v307_v13  ;;  %v200_v55 = vld [vmem:[#allocation6 + $0x358] sm:$0xff] }
  0xbd   :  { %530 = vmatpush.msra.mxu0 %v111_v14  ;;  %550 = vmatpush.msra.mxu1 %v175_v15  ;;  %v264_v56 = vld [vmem:[#allocation6 + $0x558] sm:$0xff] }
  0xbe   :  { %570 = vmatpush.msra.mxu2 %v239_v16  ;;  %590 = vmatpush.msra.mxu3 %v303_v17  ;;  %v328_v57 = vld [vmem:[#allocation6 + $0x758] sm:$0xff] }
  0xbf   :  { %531 = vmatpush.msra.mxu0 %v107_v18  ;;  %551 = vmatpush.msra.mxu1 %v171_v19  ;;  %v132_v58 = vld [vmem:[#allocation6 + $0x138] sm:$0xff] }
  0xc0   :  { %571 = vmatpush.msra.mxu2 %v235_v20  ;;  %591 = vmatpush.msra.mxu3 %v299_v21  ;;  %v196_v59 = vld [vmem:[#allocation6 + $0x338] sm:$0xff] }
  0xc1   :  { %532 = vmatpush.msra.mxu0 %v103_v22  ;;  %552 = vmatpush.msra.mxu1 %v167_v23  ;;  %v260_v60 = vld [vmem:[#allocation6 + $0x538] sm:$0xff] }
  0xc2   :  { %572 = vmatpush.msra.mxu2 %v231_v24  ;;  %592 = vmatpush.msra.mxu3 %v295_v25  ;;  %v324_v61 = vld [vmem:[#allocation6 + $0x738] sm:$0xff] }
  0xc3   :  { %533 = vmatpush.msra.mxu0 %v99_v26  ;;  %553 = vmatpush.msra.mxu1 %v163_v27  ;;  %v128_v62 = vld [vmem:[#allocation6 + $0x118] sm:$0xff] }
  0xc4   :  { %573 = vmatpush.msra.mxu2 %v227_v28  ;;  %593 = vmatpush.msra.mxu3 %v291_v29  ;;  %v192_v63 = vld [vmem:[#allocation6 + $0x318] sm:$0xff] }
  0xc5   :  { %534 = vmatpush.msra.mxu0 %v95_v34  ;;  %554 = vmatpush.msra.mxu1 %v159_v35  ;;  %v256_v4 = vld [vmem:[#allocation6 + $0x518] sm:$0xff] }
  0xc6   :  { %574 = vmatpush.msra.mxu2 %v223_v36  ;;  %594 = vmatpush.msra.mxu3 %v287_v37  ;;  %v320_v5 = vld [vmem:[#allocation6 + $0x718] sm:$0xff] }
  0xc7   :  { %535 = vmatmul.f32.vlgmr.msra.gmra.mxu0 %v921_v30  ;;  %555 = vmatmul.f32.vlgmr.msra.gmra.mxu1 %v924_v31  ;;  %v124_v6 = vld [vmem:[#allocation6 + $0xf8] sm:$0xff] }
  0xc8   :  { %575 = vmatmul.f32.vlgmr.msra.gmra.mxu2 %v927_v32  ;;  %595 = vmatmul.f32.vlgmr.msra.gmra.mxu3 %v930_v33  ;;  %v188_v7 = vld [vmem:[#allocation6 + $0x2f8] sm:$0xff] }
  0xc9   :  { %599 = vmatpush.msrb.mxu0 %v156_v0  ;;  %619 = vmatpush.msrb.mxu1 %v220_v1  ;;  %v252_v8 = vld [vmem:[#allocation6 + $0x4f8] sm:$0xff] }
  0xca   :  { %639 = vmatpush.msrb.mxu2 %v284_v2  ;;  %659 = vmatpush.msrb.mxu3 %v348_v38  ;;  %v316_v9 = vld [vmem:[#allocation6 + $0x6f8] sm:$0xff] }
  0xcb   :  { %600 = vmatpush.msrb.mxu0 %v152_v3  ;;  %620 = vmatpush.msrb.mxu1 %v216_v39  ;;  %v120_v10 = vld [vmem:[#allocation6 + $0xd8] sm:$0xff] }
  0xcc   :  { %640 = vmatpush.msrb.mxu2 %v280_v40  ;;  %660 = vmatpush.msrb.mxu3 %v344_v41  ;;  %v184_v11 = vld [vmem:[#allocation6 + $0x2d8] sm:$0xff] }
  0xcd   :  { %601 = vmatpush.msrb.mxu0 %v148_v42  ;;  %621 = vmatpush.msrb.mxu1 %v212_v43  ;;  %v248_v12 = vld [vmem:[#allocation6 + $0x4d8] sm:$0xff] }
  0xce   :  { %641 = vmatpush.msrb.mxu2 %v276_v44  ;;  %661 = vmatpush.msrb.mxu3 %v340_v45  ;;  %v312_v13 = vld [vmem:[#allocation6 + $0x6d8] sm:$0xff] }
  0xcf   :  { %602 = vmatpush.msrb.mxu0 %v144_v46  ;;  %622 = vmatpush.msrb.mxu1 %v208_v47  ;;  %v116_v14 = vld [vmem:[#allocation6 + $0xb8] sm:$0xff]  ;;  %v349_v46 = vld [vmem:[#allocation8] sm:$0xf] }
  0xd0   :  { %642 = vmatpush.msrb.mxu2 %v272_v48  ;;  %662 = vmatpush.msrb.mxu3 %v336_v49  ;;  %v180_v15 = vld [vmem:[#allocation6 + $0x2b8] sm:$0xff]  ;;  %v352_v48 = vperm.slane %v349_v46, 1  ;;  %v351_v49 = vperm.slane %v349_v46, 0 }
  0xd1   :  { %603 = vmatpush.msrb.mxu0 %v140_v50  ;;  %623 = vmatpush.msrb.mxu1 %v204_v51  ;;  %v244_v16 = vld [vmem:[#allocation6 + $0x4b8] sm:$0xff]  ;;  %v353_v50 = vperm.slane %v349_v46, 2 }
  0xd2   :  { %643 = vmatpush.msrb.mxu2 %v268_v52  ;;  %663 = vmatpush.msrb.mxu3 %v332_v53  ;;  %v308_v17 = vld [vmem:[#allocation6 + $0x6b8] sm:$0xff] }
  0xd3   :  { %604 = vmatpush.msrb.mxu0 %v136_v54  ;;  %624 = vmatpush.msrb.mxu1 %v200_v55  ;;  %v112_v18 = vld [vmem:[#allocation6 + $0x98] sm:$0xff] }
  0xd4   :  { %644 = vmatpush.msrb.mxu2 %v264_v56  ;;  %664 = vmatpush.msrb.mxu3 %v328_v57  ;;  %v176_v19 = vld [vmem:[#allocation6 + $0x298] sm:$0xff] }
  0xd5   :  { %605 = vmatpush.msrb.mxu0 %v132_v58  ;;  %625 = vmatpush.msrb.mxu1 %v196_v59  ;;  %v240_v20 = vld [vmem:[#allocation6 + $0x498] sm:$0xff] }
  0xd6   :  { %645 = vmatpush.msrb.mxu2 %v260_v60  ;;  %665 = vmatpush.msrb.mxu3 %v324_v61  ;;  %v304_v21 = vld [vmem:[#allocation6 + $0x698] sm:$0xff] }
  0xd7   :  { %606 = vmatpush.msrb.mxu0 %v128_v62  ;;  %626 = vmatpush.msrb.mxu1 %v192_v63  ;;  %v108_v22 = vld [vmem:[#allocation6 + $0x78] sm:$0xff] }
  0xd8   :  { %646 = vmatpush.msrb.mxu2 %v256_v4  ;;  %666 = vmatpush.msrb.mxu3 %v320_v5  ;;  %v172_v23 = vld [vmem:[#allocation6 + $0x278] sm:$0xff] }
  0xd9   :  { %607 = vmatpush.msrb.mxu0 %v124_v6  ;;  %627 = vmatpush.msrb.mxu1 %v188_v7  ;;  %v236_v24 = vld [vmem:[#allocation6 + $0x478] sm:$0xff] }
  0xda   :  { %647 = vmatpush.msrb.mxu2 %v252_v8  ;;  %667 = vmatpush.msrb.mxu3 %v316_v9  ;;  %v300_v25 = vld [vmem:[#allocation6 + $0x678] sm:$0xff] }
  0xdb   :  { %608 = vmatpush.msrb.mxu0 %v120_v10  ;;  %628 = vmatpush.msrb.mxu1 %v184_v11  ;;  %v104_v26 = vld [vmem:[#allocation6 + $0x58] sm:$0xff] }
  0xdc   :  { %648 = vmatpush.msrb.mxu2 %v248_v12  ;;  %668 = vmatpush.msrb.mxu3 %v312_v13  ;;  %v168_v27 = vld [vmem:[#allocation6 + $0x258] sm:$0xff] }
  0xdd   :  { %609 = vmatpush.msrb.mxu0 %v116_v14  ;;  %629 = vmatpush.msrb.mxu1 %v180_v15  ;;  %v232_v28 = vld [vmem:[#allocation6 + $0x458] sm:$0xff] }
  0xde   :  { %649 = vmatpush.msrb.mxu2 %v244_v16  ;;  %669 = vmatpush.msrb.mxu3 %v308_v17  ;;  %v296_v29 = vld [vmem:[#allocation6 + $0x658] sm:$0xff] }
  0xdf   :  { %610 = vmatpush.msrb.mxu0 %v112_v18  ;;  %630 = vmatpush.msrb.mxu1 %v176_v19  ;;  %v100_v34 = vld [vmem:[#allocation6 + $0x38] sm:$0xff] }
  0xe0   :  { %650 = vmatpush.msrb.mxu2 %v240_v20  ;;  %670 = vmatpush.msrb.mxu3 %v304_v21  ;;  %v164_v35 = vld [vmem:[#allocation6 + $0x238] sm:$0xff] }
  0xe1   :  { %611 = vmatpush.msrb.mxu0 %v108_v22  ;;  %631 = vmatpush.msrb.mxu1 %v172_v23  ;;  %v228_v36 = vld [vmem:[#allocation6 + $0x438] sm:$0xff] }
  0xe2   :  { %651 = vmatpush.msrb.mxu2 %v236_v24  ;;  %671 = vmatpush.msrb.mxu3 %v300_v25  ;;  %v292_v37 = vld [vmem:[#allocation6 + $0x638] sm:$0xff] }
  0xe3   :  { %612 = vmatpush.msrb.mxu0 %v104_v26  ;;  %632 = vmatpush.msrb.mxu1 %v168_v27  ;;  %v96_v0 = vld [vmem:[#allocation6 + $0x18] sm:$0xff] }
  0xe4   :  { %652 = vmatpush.msrb.mxu2 %v232_v28  ;;  %672 = vmatpush.msrb.mxu3 %v296_v29  ;;  %v160_v1 = vld [vmem:[#allocation6 + $0x218] sm:$0xff] }
  0xe5   :  { %613 = vmatpush.msrb.mxu0 %v100_v34  ;;  %633 = vmatpush.msrb.mxu1 %v164_v35  ;;  %v224_v2 = vld [vmem:[#allocation6 + $0x418] sm:$0xff] }
  0xe6   :  { %v288_v38 = vld [vmem:[#allocation6 + $0x618] sm:$0xff]  ;;  %653 = vmatpush.msrb.mxu2 %v228_v36  ;;  %673 = vmatpush.msrb.mxu3 %v292_v37 }
  0xe7   :  { %614 = vmatpush.msrb.mxu0 %v96_v0  ;;  %634 = vmatpush.msrb.mxu1 %v160_v1 }
  0xe8   :  { %654 = vmatpush.msrb.mxu2 %v224_v2  ;;  %674 = vmatpush.msrb.mxu3 %v288_v38 }
  0xe9   :  { %615 = vmatmul.f32.vlgmr.msrb.gmra.mxu0 %v921_v30  ;;  %635 = vmatmul.f32.vlgmr.msrb.gmra.mxu1 %v924_v31  ;;  %v354_v31 = vperm.slane %v349_v46, 3 }
  0xea   :  { %655 = vmatmul.f32.vlgmr.msrb.gmra.mxu2 %v927_v32  ;;  %675 = vmatmul.f32.vlgmr.msrb.gmra.mxu3 %v930_v33 }
 0x120   :  { %v376_v3 = vpop.f32.mrf.mxu0  ;;  %v396_v39 = vpop.f32.mrf.mxu1 }
 0x121   :  { %v377_v32 = vadd.f32 %v376_v3, %v351_v49 }
 0x123   :  { %v397_v57 = vadd.f32 %v396_v39, %v377_v32 }
 0x127   :  { %v416_v40 = vpop.f32.mrf.mxu2  ;;  %v436_v41 = vpop.f32.mrf.mxu3 }
 0x128   :  { %v417_v61 = vadd.f32 %v416_v40, %v397_v57 }
 0x12a   :  { %v456_v42 = vpop.f32.mrf.mxu0  ;;  %v476_v43 = vpop.f32.mrf.mxu1  ;;  %v437_v8 = vadd.f32 %v436_v41, %v417_v61 }
 0x12b   :  { %v457_v51 = vadd.f32 %v456_v42, %v352_v48 }
 0x12d   :  { %v477_v55 = vadd.f32 %v476_v43, %v457_v51 }
 0x131   :  { %v496_v44 = vpop.f32.mrf.mxu2  ;;  %v516_v47 = vpop.f32.mrf.mxu3 }
 0x132   :  { %v497_v58 = vadd.f32 %v496_v44, %v477_v55 }
 0x134   :  { %v517_v5 = vadd.f32 %v516_v47, %v497_v58 }
 0x136   :  { %v679_v11 = vmax.f32 %v437_v8, %v517_v5 }
 0x144   :  { %v536_v45 = vpop.f32.mrf.mxu0  ;;  %v556_v30 = vpop.f32.mrf.mxu1 }
 0x145   :  { %v537_v53 = vadd.f32 %v536_v45, %v353_v50 }
 0x147   :  { %v557_v59 = vadd.f32 %v556_v30, %v537_v53 }
 0x14b   :  { %v576_v52 = vpop.f32.mrf.mxu2  ;;  %v596_v54 = vpop.f32.mrf.mxu3 }
 0x14c   :  { %v577_v62 = vadd.f32 %v576_v52, %v557_v59 }
 0x14e   :  { %v597_v9 = vadd.f32 %v596_v54, %v577_v62 }
 0x166   :  { %v616_v33 = vpop.f32.mrf.mxu0  ;;  %v636_v60 = vpop.f32.mrf.mxu1 }
 0x167   :  { %v617_v56 = vadd.f32 %v616_v33, %v354_v31 }
 0x169   :  { %v637_v63 = vadd.f32 %v636_v60, %v617_v56 }
 0x16d   :  { %v656_v4 = vpop.f32.mrf.mxu2  ;;  %v676_v7 = vpop.f32.mrf.mxu3 }
 0x16e   :  { %v657_v6 = vadd.f32 %v656_v4, %v637_v63 }
 0x170   :  { %v677_v10 = vadd.f32 %v676_v7, %v657_v6 }
 0x172   :  { %v680_v12 = vmax.f32 %v597_v9, %v677_v10 }
 0x174   :  { %v681_v13 = vmax.f32 %v679_v11, %v680_v12 }
 0x176   :  { %682 = vmax.xlane.f32.xlu0 %v681_v13 }
 0x1e9   :  { %v683_v14 = vpop.xlane.xlu0 %682 }
 0x1ea   :  { %v684_v15 = vsub.f32 %v437_v8, %v683_v14  ;;  %v685_v16 = vsub.f32 %v517_v5, %v683_v14  ;;  %v686_v17 = vsub.f32 %v597_v9, %v683_v14  ;;  %v687_v18 = vsub.f32 %v677_v10, %v683_v14 }
 0x1ec   :  { %v688_v19 = vmul.f32 1.442695, %v684_v15  ;;  %v690_v20 = vmul.f32 1.442695, %v685_v16  ;;  %v692_v21 = vmul.f32 1.442695, %v686_v17 }
 0x1ed   :  { %v694_v22 = vmul.f32 1.442695, %v687_v18 }
 0x1ee   :  { %749 = vpow2.f32 %v688_v19 }
 0x1ef   :  { %751 = vpow2.f32 %v690_v20 }
 0x1f0   :  { %753 = vpow2.f32 %v692_v21 }
 0x1f1   :  { %755 = vpow2.f32 %v694_v22 }
 0x1f4   :  { %v750_v23 = vpop.eup %749 }
 0x1f5   :  { %v752_v24 = vpop.eup %751 }
 0x1f6   :  { %v696_v25 = vadd.f32 %v752_v24, %v750_v23  ;;  %v754_v26 = vpop.eup %753 }
 0x1f7   :  { %v756_v28 = vpop.eup %755 }
 0x1f8   :  { %v697_v27 = vadd.f32 %v754_v26, %v696_v25 }
 0x1fa   :  { %v698_v29 = vadd.f32 %v756_v28, %v697_v27 }
 0x1fc   :  { %699 = vadd.xlane.f32.xlu1 %v698_v29 }
 0x26f   :  { %v700_v34 = vpop.xlane.xlu1 %699 }
 0x270   :  { %757 = vrcp.f32 %v700_v34  ;;  %v712_v0 = vand.u32 2147483648, %v700_v34  ;;  %v710_v2 = vand.u32 2147483647, %v700_v34  ;;  %vm706_vm4 = vweird.f32 %v700_v34 }
 0x272   :  { %v713_v3 = vor.u32 1.1754944e-38, %v712_v0  ;;  %vm711_vm6 = vcmp.eq.f32.partialorder %v710_v2, 8.507059e+37 }
 0x276   :  { %v758_v35 = vpop.eup %757 }
 0x277   :  { %v702_v36 = vmul.f32 %v758_v35, %v700_v34  ;;  %vm707_vm3 = vweird.f32 %v758_v35 }
 0x278   :  { %vm708_vm5 = vmor %vm706_vm4, %vm707_vm3 }
 0x279   :  { %v703_v37 = vsub.f32 1.0, %v702_v36 }
 0x27b   :  { %v704_v1 = vmul.f32 %v758_v35, %v703_v37 }
 0x27d   :  { %v705_v38 = vadd.f32 %v758_v35, %v704_v1 }
 0x27f   :  { %v709_v39 = vsel %vm708_vm5, %v758_v35, %v705_v38 }
 0x280   :  { %v714_v40 = vsel %vm711_vm6, %v713_v3, %v709_v39 }
 0x281   :  { %v715_v41 = vmul.f32 %v750_v23, %v714_v40  ;;  %v716_v42 = vmul.f32 %v752_v24, %v714_v40  ;;  %v717_v43 = vmul.f32 %v754_v26, %v714_v40  ;;  %v718_v44 = vmul.f32 %v756_v28, %v714_v40 }
 0x283   :  { %719 = vst [vmem:[#allocation9] sm:$0xff] %v715_v41 }
 0x284   :  { %720 = vst [vmem:[#allocation9 + $0x8] sm:$0xff] %v716_v42 }
 0x285   :  { %721 = vst [vmem:[#allocation9 + $0x10] sm:$0xff] %v717_v43 }
 0x286   :  { %722 = vst [vmem:[#allocation9 + $0x18] sm:$0xff] %v718_v44 }
 0x287   :  { %733 = dma.vmem_to_hbm [thread:$0]  %s729_s5, 512, %s731_s8, [#allocation5]  }
 0x288   :  { %859 = dma.done.wait [#allocation5], 512  }
 0x289   :  { %860 = vsyncadd [#allocation5], 4294966784 }
 0x28a   :  { %738 = vsyncpa [#allocation4], 1 }
 0x28b   :  { %739 = vsyncpa [#allocation7], 1 }
 0x28c   :  { %740 = vsyncpa [#allocation5], 1 }

// kernel: tpu_custom_call.1
= control target key start
LH: loop header
LB: loop body
LE: loop exit
PB: predicated region body
PF: predicated region fallthrough
CT: control target
= control target key end

     0   :  { %10 = vsyncpa [#allocation4], 0  ;;  %s951_s0 = inlined_call_operand.<no memory space> [shape: f32[1], index: 0, kind: input, shape index: {}]   ;;  %s952_s1 = inlined_call_operand.hbm [shape: f32[8,512], index: 1, kind: input, shape index: {}]   ;;  %s953_s2 = inlined_call_operand.hbm [shape: f32[512,512], index: 2, kind: input, shape index: {}]   ;;  %s954_s3 = inlined_call_operand.hbm [shape: f32[1,512], index: 3, kind: input, shape index: {}]   ;;  %s955_s4 = inlined_call_operand.hbm [shape: f32[8,512], index: 4, kind: output, shape index: {}]  }
   0x1   :  { %11 = vsyncpa [#allocation7], 0  ;;  %s30_s17 = sshll.u32 %s953_s2, 4  ;;  %s31_s17 = int_to_ptr.hbm [resolvable:$true] %s30_s17 }
   0x2   :  { %12 = vsyncpa [#allocation5], 0  ;;  %s861_s18 = smov [#allocation6]   ;;  %s20_s22 = sshll.u32 %s952_s1, 4  ;;  %s21_s22 = int_to_ptr.hbm [resolvable:$true] %s20_s22 }
   0x3   :  { %s32_s19 = sshll.u32 %s861_s18, 4  ;;  %s862_s23 = smov 512   ;;  %s33_s19 = int_to_ptr.vmem [resolvable:$true] %s32_s19 }
   0x4   :  { %s863_s24 = smov 32   ;;  %s864_s25 = smov [#allocation3]  }
   0x5   :  { %38 = dma.hbm_to_vmem [thread:$0]  %s31_s17, 32768, %s33_s19, [#allocation7], %s862_s23, %s862_s23, %s863_s24  }
   0x6   :  { %s22_s26 = sshll.u32 %s864_s25, 4  ;;  %s44_s29 = sshll.u32 %s954_s3, 4  ;;  %s23_s26 = int_to_ptr.vmem [resolvable:$true] %s22_s26  ;;  %s45_s29 = int_to_ptr.hbm [resolvable:$true] %s44_s29 }
   0x7   :  { %25 = dma.hbm_to_vmem [thread:$0]  %s21_s22, 512, %s23_s26, [#allocation4]  }
   0x8   :  { %s865_s2 = smov [#allocation8]  }
   0x9   :  { %s46_s30 = sshll.u32 %s865_s2, 4  ;;  %s47_s30 = int_to_ptr.vmem [resolvable:$true] %s46_s30 }
   0xa   :  { %49 = dma.hbm_to_vmem [thread:$0]  %s45_s29, 64, %s47_s30, [#allocation7]  }
   0xb   :  { %855 = dma.done.wait [#allocation4], 512  }
   0xc   :  { %856 = vsyncadd [#allocation4], 4294966784 }
   0xd   :  { %857 = dma.done.wait [#allocation7], 32832  }
   0xe   :  { %858 = vsyncadd [#allocation7], 4294934464  ;;  %v901_v0 = vld [vmem:[#allocation3] sm:$0xff]  ;;  %v903_v1 = vld [vmem:[#allocation3 + $0x8] sm:$0xff]  ;;  %s730_s8 = sshll.u32 %s955_s4, 4  ;;  %s731_s8 = int_to_ptr.hbm [resolvable:$true] %s730_s8 }
   0xf   :  { %v905_v2 = vld [vmem:[#allocation3 + $0x10] sm:$0xff]  ;;  %v907_v3 = vld [vmem:[#allocation3 + $0x18] sm:$0xff]  ;;  %v66_v4 = vmul.f32 %v901_v0, %v901_v0  ;;  %v67_v5 = vmul.f32 %v903_v1, %v903_v1  ;;  %v153_v7 = vld [vmem:[#allocation6 + $0x1e0] sm:$0xff] }
  0x10   :  { %v68_v6 = vmul.f32 %v905_v2, %v905_v2  ;;  %v217_v8 = vld [vmem:[#allocation6 + $0x3e0] sm:$0xff]  ;;  %359 = vmatpush.msra.mxu0 %v153_v7  ;;  %v69_v12 = vmul.f32 %v907_v3, %v907_v3 }
  0x11   :  { %379 = vmatpush.msra.mxu1 %v217_v8  ;;  %v281_v9 = vld [vmem:[#allocation6 + $0x5e0] sm:$0xff]  ;;  %v70_v13 = vadd.f32 %v67_v5, %v66_v4 }
  0x12   :  { %v345_v10 = vld [vmem:[#allocation6 + $0x7e0] sm:$0xff]  ;;  %399 = vmatpush.msra.mxu2 %v281_v9 }
  0x13   :  { %v149_v11 = vld [vmem:[#allocation6 + $0x1c0] sm:$0xff]  ;;  %419 = vmatpush.msra.mxu3 %v345_v10  ;;  %v71_v20 = vadd.f32 %v70_v13, %v68_v6 }
  0x14   :  { %v213_v14 = vld [vmem:[#allocation6 + $0x3c0] sm:$0xff]  ;;  %360 = vmatpush.msra.mxu0 %v149_v11 }
  0x15   :  { %v277_v15 = vld [vmem:[#allocation6 + $0x5c0] sm:$0xff]  ;;  %380 = vmatpush.msra.mxu1 %v213_v14  ;;  %v72_v25 = vadd.f32 %v71_v20, %v69_v12  ;;  %v214_v20 = vld [vmem:[#allocation6 + $0x3c8] sm:$0xff] }
  0x16   :  { %v341_v16 = vld [vmem:[#allocation6 + $0x7c0] sm:$0xff]  ;;  %400 = vmatpush.msra.mxu2 %v277_v15  ;;  %v154_v15 = vld [vmem:[#allocation6 + $0x1e8] sm:$0xff] }
  0x17   :  { %v145_v17 = vld [vmem:[#allocation6 + $0x1a0] sm:$0xff]  ;;  %420 = vmatpush.msra.mxu3 %v341_v16  ;;  %73 = vadd.xlane.f32.xlu0 %v72_v25  ;;  %v218_v16 = vld [vmem:[#allocation6 + $0x3e8] sm:$0xff] }
  0x18   :  { %v209_v18 = vld [vmem:[#allocation6 + $0x3a0] sm:$0xff]  ;;  %361 = vmatpush.msra.mxu0 %v145_v17  ;;  %v282_v17 = vld [vmem:[#allocation6 + $0x5e8] sm:$0xff] }
  0x19   :  { %v273_v19 = vld [vmem:[#allocation6 + $0x5a0] sm:$0xff]  ;;  %381 = vmatpush.msra.mxu1 %v209_v18  ;;  %v346_v18 = vld [vmem:[#allocation6 + $0x7e8] sm:$0xff] }
  0x1a   :  { %v337_v21 = vld [vmem:[#allocation6 + $0x7a0] sm:$0xff]  ;;  %401 = vmatpush.msra.mxu2 %v273_v19  ;;  %v150_v19 = vld [vmem:[#allocation6 + $0x1c8] sm:$0xff] }
  0x1b   :  { %v141_v22 = vld [vmem:[#allocation6 + $0x180] sm:$0xff]  ;;  %421 = vmatpush.msra.mxu3 %v337_v21  ;;  %v278_v21 = vld [vmem:[#allocation6 + $0x5c8] sm:$0xff] }
  0x1c   :  { %v205_v23 = vld [vmem:[#allocation6 + $0x380] sm:$0xff]  ;;  %362 = vmatpush.msra.mxu0 %v141_v22  ;;  %v342_v22 = vld [vmem:[#allocation6 + $0x7c8] sm:$0xff] }
  0x1d   :  { %v269_v24 = vld [vmem:[#allocation6 + $0x580] sm:$0xff]  ;;  %382 = vmatpush.msra.mxu1 %v205_v23  ;;  %v146_v23 = vld [vmem:[#allocation6 + $0x1a8] sm:$0xff] }
  0x1e   :  { %v333_v26 = vld [vmem:[#allocation6 + $0x780] sm:$0xff]  ;;  %402 = vmatpush.msra.mxu2 %v269_v24  ;;  %v210_v24 = vld [vmem:[#allocation6 + $0x3a8] sm:$0xff] }
  0x1f   :  { %v137_v27 = vld [vmem:[#allocation6 + $0x160] sm:$0xff]  ;;  %422 = vmatpush.msra.mxu3 %v333_v26  ;;  %v274_v25 = vld [vmem:[#allocation6 + $0x5a8] sm:$0xff] }
  0x20   :  { %v201_v28 = vld [vmem:[#allocation6 + $0x360] sm:$0xff]  ;;  %363 = vmatpush.msra.mxu0 %v137_v27  ;;  %v338_v26 = vld [vmem:[#allocation6 + $0x7a8] sm:$0xff] }
  0x21   :  { %v265_v29 = vld [vmem:[#allocation6 + $0x560] sm:$0xff]  ;;  %383 = vmatpush.msra.mxu1 %v201_v28  ;;  %v142_v27 = vld [vmem:[#allocation6 + $0x188] sm:$0xff] }
  0x22   :  { %v329_v30 = vld [vmem:[#allocation6 + $0x760] sm:$0xff]  ;;  %403 = vmatpush.msra.mxu2 %v265_v29  ;;  %v206_v28 = vld [vmem:[#allocation6 + $0x388] sm:$0xff] }
  0x23   :  { %v133_v31 = vld [vmem:[#allocation6 + $0x140] sm:$0xff]  ;;  %423 = vmatpush.msra.mxu3 %v329_v30  ;;  %v270_v29 = vld [vmem:[#allocation6 + $0x588] sm:$0xff] }
  0x24   :  { %v197_v32 = vld [vmem:[#allocation6 + $0x340] sm:$0xff]  ;;  %364 = vmatpush.msra.mxu0 %v133_v31  ;;  %v334_v30 = vld [vmem:[#allocation6 + $0x788] sm:$0xff] }
  0x25   :  { %v261_v33 = vld [vmem:[#allocation6 + $0x540] sm:$0xff]  ;;  %384 = vmatpush.msra.mxu1 %v197_v32  ;;  %v138_v31 = vld [vmem:[#allocation6 + $0x168] sm:$0xff] }
  0x26   :  { %v325_v34 = vld [vmem:[#allocation6 + $0x740] sm:$0xff]  ;;  %404 = vmatpush.msra.mxu2 %v261_v33  ;;  %v202_v32 = vld [vmem:[#allocation6 + $0x368] sm:$0xff] }
  0x27   :  { %v129_v35 = vld [vmem:[#allocation6 + $0x120] sm:$0xff]  ;;  %424 = vmatpush.msra.mxu3 %v325_v34  ;;  %v266_v33 = vld [vmem:[#allocation6 + $0x568] sm:$0xff] }
  0x28   :  { %v193_v36 = vld [vmem:[#allocation6 + $0x320] sm:$0xff]  ;;  %365 = vmatpush.msra.mxu0 %v129_v35  ;;  %v330_v34 = vld [vmem:[#allocation6 + $0x768] sm:$0xff] }
  0x29   :  { %v257_v37 = vld [vmem:[#allocation6 + $0x520] sm:$0xff]  ;;  %385 = vmatpush.msra.mxu1 %v193_v36  ;;  %v134_v35 = vld [vmem:[#allocation6 + $0x148] sm:$0xff] }
  0x2a   :  { %v321_v38 = vld [vmem:[#allocation6 + $0x720] sm:$0xff]  ;;  %405 = vmatpush.msra.mxu2 %v257_v37  ;;  %v198_v36 = vld [vmem:[#allocation6 + $0x348] sm:$0xff] }
  0x2b   :  { %v125_v39 = vld [vmem:[#allocation6 + $0x100] sm:$0xff]  ;;  %425 = vmatpush.msra.mxu3 %v321_v38  ;;  %v262_v37 = vld [vmem:[#allocation6 + $0x548] sm:$0xff] }
  0x2c   :  { %v189_v40 = vld [vmem:[#allocation6 + $0x300] sm:$0xff]  ;;  %366 = vmatpush.msra.mxu0 %v125_v39  ;;  %v326_v38 = vld [vmem:[#allocation6 + $0x748] sm:$0xff] }
  0x2d   :  { %v253_v41 = vld [vmem:[#allocation6 + $0x500] sm:$0xff]  ;;  %386 = vmatpush.msra.mxu1 %v189_v40  ;;  %v130_v39 = vld [vmem:[#allocation6 + $0x128] sm:$0xff] }
  0x2e   :  { %v317_v42 = vld [vmem:[#allocation6 + $0x700] sm:$0xff]  ;;  %406 = vmatpush.msra.mxu2 %v253_v41  ;;  %v194_v40 = vld [vmem:[#allocation6 + $0x328] sm:$0xff] }
  0x2f   :  { %v121_v43 = vld [vmem:[#allocation6 + $0xe0] sm:$0xff]  ;;  %426 = vmatpush.msra.mxu3 %v317_v42  ;;  %v258_v41 = vld [vmem:[#allocation6 + $0x528] sm:$0xff] }
  0x30   :  { %v185_v44 = vld [vmem:[#allocation6 + $0x2e0] sm:$0xff]  ;;  %367 = vmatpush.msra.mxu0 %v121_v43  ;;  %v322_v42 = vld [vmem:[#allocation6 + $0x728] sm:$0xff] }
  0x31   :  { %v249_v45 = vld [vmem:[#allocation6 + $0x4e0] sm:$0xff]  ;;  %387 = vmatpush.msra.mxu1 %v185_v44  ;;  %v126_v43 = vld [vmem:[#allocation6 + $0x108] sm:$0xff] }
  0x32   :  { %v313_v46 = vld [vmem:[#allocation6 + $0x6e0] sm:$0xff]  ;;  %407 = vmatpush.msra.mxu2 %v249_v45  ;;  %v190_v44 = vld [vmem:[#allocation6 + $0x308] sm:$0xff] }
  0x33   :  { %v117_v47 = vld [vmem:[#allocation6 + $0xc0] sm:$0xff]  ;;  %427 = vmatpush.msra.mxu3 %v313_v46  ;;  %v254_v45 = vld [vmem:[#allocation6 + $0x508] sm:$0xff] }
  0x34   :  { %v181_v48 = vld [vmem:[#allocation6 + $0x2c0] sm:$0xff]  ;;  %368 = vmatpush.msra.mxu0 %v117_v47  ;;  %v318_v46 = vld [vmem:[#allocation6 + $0x708] sm:$0xff] }
  0x35   :  { %v245_v49 = vld [vmem:[#allocation6 + $0x4c0] sm:$0xff]  ;;  %388 = vmatpush.msra.mxu1 %v181_v48  ;;  %v122_v47 = vld [vmem:[#allocation6 + $0xe8] sm:$0xff] }
  0x36   :  { %v309_v50 = vld [vmem:[#allocation6 + $0x6c0] sm:$0xff]  ;;  %408 = vmatpush.msra.mxu2 %v245_v49  ;;  %v186_v48 = vld [vmem:[#allocation6 + $0x2e8] sm:$0xff] }
  0x37   :  { %v113_v51 = vld [vmem:[#allocation6 + $0xa0] sm:$0xff]  ;;  %428 = vmatpush.msra.mxu3 %v309_v50  ;;  %v250_v49 = vld [vmem:[#allocation6 + $0x4e8] sm:$0xff] }
  0x38   :  { %v177_v52 = vld [vmem:[#allocation6 + $0x2a0] sm:$0xff]  ;;  %369 = vmatpush.msra.mxu0 %v113_v51  ;;  %v314_v50 = vld [vmem:[#allocation6 + $0x6e8] sm:$0xff] }
  0x39   :  { %v241_v53 = vld [vmem:[#allocation6 + $0x4a0] sm:$0xff]  ;;  %389 = vmatpush.msra.mxu1 %v177_v52  ;;  %v118_v51 = vld [vmem:[#allocation6 + $0xc8] sm:$0xff] }
  0x3a   :  { %v305_v54 = vld [vmem:[#allocation6 + $0x6a0] sm:$0xff]  ;;  %409 = vmatpush.msra.mxu2 %v241_v53  ;;  %v182_v52 = vld [vmem:[#allocation6 + $0x2c8] sm:$0xff] }
  0x3b   :  { %v109_v55 = vld [vmem:[#allocation6 + $0x80] sm:$0xff]  ;;  %429 = vmatpush.msra.mxu3 %v305_v54  ;;  %v246_v53 = vld [vmem:[#allocation6 + $0x4c8] sm:$0xff] }
  0x3c   :  { %v173_v56 = vld [vmem:[#allocation6 + $0x280] sm:$0xff]  ;;  %370 = vmatpush.msra.mxu0 %v109_v55  ;;  %v310_v54 = vld [vmem:[#allocation6 + $0x6c8] sm:$0xff] }
  0x3d   :  { %v237_v57 = vld [vmem:[#allocation6 + $0x480] sm:$0xff]  ;;  %390 = vmatpush.msra.mxu1 %v173_v56  ;;  %v114_v55 = vld [vmem:[#allocation6 + $0xa8] sm:$0xff] }
  0x3e   :  { %v301_v58 = vld [vmem:[#allocation6 + $0x680] sm:$0xff]  ;;  %410 = vmatpush.msra.mxu2 %v237_v57  ;;  %v178_v56 = vld [vmem:[#allocation6 + $0x2a8] sm:$0xff] }
  0x3f   :  { %v105_v59 = vld [vmem:[#allocation6 + $0x60] sm:$0xff]  ;;  %430 = vmatpush.msra.mxu3 %v301_v58  ;;  %v242_v57 = vld [vmem:[#allocation6 + $0x4a8] sm:$0xff] }
  0x40   :  { %v169_v60 = vld [vmem:[#allocation6 + $0x260] sm:$0xff]  ;;  %371 = vmatpush.msra.mxu0 %v105_v59  ;;  %v306_v58 = vld [vmem:[#allocation6 + $0x6a8] sm:$0xff] }
  0x41   :  { %v233_v61 = vld [vmem:[#allocation6 + $0x460] sm:$0xff]  ;;  %391 = vmatpush.msra.mxu1 %v169_v60  ;;  %v110_v59 = vld [vmem:[#allocation6 + $0x88] sm:$0xff] }
  0x42   :  { %v297_v62 = vld [vmem:[#allocation6 + $0x660] sm:$0xff]  ;;  %411 = vmatpush.msra.mxu2 %v233_v61  ;;  %v174_v60 = vld [vmem:[#allocation6 + $0x288] sm:$0xff] }
  0x43   :  { %v101_v63 = vld [vmem:[#allocation6 + $0x40] sm:$0xff]  ;;  %431 = vmatpush.msra.mxu3 %v297_v62  ;;  %v238_v61 = vld [vmem:[#allocation6 + $0x488] sm:$0xff] }
  0x44   :  { %v165_v4 = vld [vmem:[#allocation6 + $0x240] sm:$0xff]  ;;  %372 = vmatpush.msra.mxu0 %v101_v63  ;;  %v302_v62 = vld [vmem:[#allocation6 + $0x688] sm:$0xff] }
  0x45   :  { %v229_v5 = vld [vmem:[#allocation6 + $0x440] sm:$0xff]  ;;  %392 = vmatpush.msra.mxu1 %v165_v4  ;;  %v106_v63 = vld [vmem:[#allocation6 + $0x68] sm:$0xff] }
  0x46   :  { %v293_v6 = vld [vmem:[#allocation6 + $0x640] sm:$0xff]  ;;  %412 = vmatpush.msra.mxu2 %v229_v5  ;;  %v170_v4 = vld [vmem:[#allocation6 + $0x268] sm:$0xff] }
  0x47   :  { %v97_v7 = vld [vmem:[#allocation6 + $0x20] sm:$0xff]  ;;  %432 = vmatpush.msra.mxu3 %v293_v6  ;;  %v234_v5 = vld [vmem:[#allocation6 + $0x468] sm:$0xff] }
  0x48   :  { %v161_v8 = vld [vmem:[#allocation6 + $0x220] sm:$0xff]  ;;  %373 = vmatpush.msra.mxu0 %v97_v7  ;;  %v298_v6 = vld [vmem:[#allocation6 + $0x668] sm:$0xff] }
  0x49   :  { %v225_v9 = vld [vmem:[#allocation6 + $0x420] sm:$0xff]  ;;  %393 = vmatpush.msra.mxu1 %v161_v8  ;;  %v102_v7 = vld [vmem:[#allocation6 + $0x48] sm:$0xff] }
  0x4a   :  { %v289_v10 = vld [vmem:[#allocation6 + $0x620] sm:$0xff]  ;;  %413 = vmatpush.msra.mxu2 %v225_v9  ;;  %v166_v8 = vld [vmem:[#allocation6 + $0x248] sm:$0xff] }
  0x4b   :  { %v93_v11 = vld [vmem:[#allocation6] sm:$0xff]  ;;  %433 = vmatpush.msra.mxu3 %v289_v10  ;;  %v230_v9 = vld [vmem:[#allocation6 + $0x448] sm:$0xff] }
  0x4c   :  { %v157_v12 = vld [vmem:[#allocation6 + $0x200] sm:$0xff]  ;;  %374 = vmatpush.msra.mxu0 %v93_v11  ;;  %v294_v10 = vld [vmem:[#allocation6 + $0x648] sm:$0xff] }
  0x4d   :  { %v221_v13 = vld [vmem:[#allocation6 + $0x400] sm:$0xff]  ;;  %394 = vmatpush.msra.mxu1 %v157_v12  ;;  %v98_v11 = vld [vmem:[#allocation6 + $0x28] sm:$0xff] }
  0x4e   :  { %v285_v14 = vld [vmem:[#allocation6 + $0x600] sm:$0xff]  ;;  %414 = vmatpush.msra.mxu2 %v221_v13  ;;  %439 = vmatpush.msrb.mxu0 %v154_v15  ;;  %v162_v12 = vld [vmem:[#allocation6 + $0x228] sm:$0xff] }
  0x4f   :  { %434 = vmatpush.msra.mxu3 %v285_v14  ;;  %459 = vmatpush.msrb.mxu1 %v218_v16  ;;  %v226_v13 = vld [vmem:[#allocation6 + $0x428] sm:$0xff] }
  0x50   :  { %479 = vmatpush.msrb.mxu2 %v282_v17  ;;  %440 = vmatpush.msrb.mxu0 %v150_v19  ;;  %v290_v14 = vld [vmem:[#allocation6 + $0x628] sm:$0xff] }
  0x51   :  { %499 = vmatpush.msrb.mxu3 %v346_v18  ;;  %460 = vmatpush.msrb.mxu1 %v214_v20  ;;  %v94_v15 = vld [vmem:[#allocation6 + $0x8] sm:$0xff] }
  0x52   :  { %480 = vmatpush.msrb.mxu2 %v278_v21  ;;  %441 = vmatpush.msrb.mxu0 %v146_v23  ;;  %v158_v16 = vld [vmem:[#allocation6 + $0x208] sm:$0xff] }
  0x53   :  { %500 = vmatpush.msrb.mxu3 %v342_v22  ;;  %461 = vmatpush.msrb.mxu1 %v210_v24  ;;  %v222_v17 = vld [vmem:[#allocation6 + $0x408] sm:$0xff] }
  0x54   :  { %481 = vmatpush.msrb.mxu2 %v274_v25  ;;  %442 = vmatpush.msrb.mxu0 %v142_v27  ;;  %v286_v18 = vld [vmem:[#allocation6 + $0x608] sm:$0xff] }
  0x55   :  { %501 = vmatpush.msrb.mxu3 %v338_v26  ;;  %462 = vmatpush.msrb.mxu1 %v206_v28  ;;  %v87_v26 = vstv %s951_s0  ;;  %s866_s0 = smov [#allocation9]  }
  0x56   :  { %482 = vmatpush.msrb.mxu2 %v270_v29  ;;  %443 = vmatpush.msrb.mxu0 %v138_v31  ;;  %s728_s5 = sshll.u32 %s866_s0, 4  ;;  %s729_s5 = int_to_ptr.vmem [resolvable:$true] %s728_s5 }
  0x57   :  { %502 = vmatpush.msrb.mxu3 %v334_v30  ;;  %463 = vmatpush.msrb.mxu1 %v202_v32 }
  0x58   :  { %483 = vmatpush.msrb.mxu2 %v266_v33  ;;  %444 = vmatpush.msrb.mxu0 %v134_v35  ;;  %v219_v35 = vld [vmem:[#allocation6 + $0x3f0] sm:$0xff] }
  0x59   :  { %503 = vmatpush.msrb.mxu3 %v330_v34  ;;  %464 = vmatpush.msrb.mxu1 %v198_v36  ;;  %v155_v34 = vld [vmem:[#allocation6 + $0x1f0] sm:$0xff] }
  0x5a   :  { %484 = vmatpush.msrb.mxu2 %v262_v37  ;;  %445 = vmatpush.msrb.mxu0 %v130_v39  ;;  %v283_v36 = vld [vmem:[#allocation6 + $0x5f0] sm:$0xff] }
  0x5b   :  { %504 = vmatpush.msrb.mxu3 %v326_v38  ;;  %465 = vmatpush.msrb.mxu1 %v194_v40  ;;  %v347_v37 = vld [vmem:[#allocation6 + $0x7f0] sm:$0xff] }
  0x5c   :  { %485 = vmatpush.msrb.mxu2 %v258_v41  ;;  %446 = vmatpush.msrb.mxu0 %v126_v43  ;;  %v343_v38 = vld [vmem:[#allocation6 + $0x7d0] sm:$0xff] }
  0x5d   :  { %505 = vmatpush.msrb.mxu3 %v322_v42  ;;  %466 = vmatpush.msrb.mxu1 %v190_v44  ;;  %v211_v39 = vld [vmem:[#allocation6 + $0x3b0] sm:$0xff] }
  0x5e   :  { %486 = vmatpush.msrb.mxu2 %v254_v45  ;;  %447 = vmatpush.msrb.mxu0 %v122_v47  ;;  %v275_v40 = vld [vmem:[#allocation6 + $0x5b0] sm:$0xff] }
  0x5f   :  { %506 = vmatpush.msrb.mxu3 %v318_v46  ;;  %467 = vmatpush.msrb.mxu1 %v186_v48  ;;  %v339_v41 = vld [vmem:[#allocation6 + $0x7b0] sm:$0xff] }
  0x60   :  { %487 = vmatpush.msrb.mxu2 %v250_v49  ;;  %448 = vmatpush.msrb.mxu0 %v118_v51  ;;  %v143_v42 = vld [vmem:[#allocation6 + $0x190] sm:$0xff] }
  0x61   :  { %507 = vmatpush.msrb.mxu3 %v314_v50  ;;  %468 = vmatpush.msrb.mxu1 %v182_v52  ;;  %v207_v43 = vld [vmem:[#allocation6 + $0x390] sm:$0xff] }
  0x62   :  { %488 = vmatpush.msrb.mxu2 %v246_v53  ;;  %449 = vmatpush.msrb.mxu0 %v114_v55  ;;  %v271_v44 = vld [vmem:[#allocation6 + $0x590] sm:$0xff] }
  0x63   :  { %508 = vmatpush.msrb.mxu3 %v310_v54  ;;  %469 = vmatpush.msrb.mxu1 %v178_v56  ;;  %v335_v45 = vld [vmem:[#allocation6 + $0x790] sm:$0xff] }
  0x64   :  { %489 = vmatpush.msrb.mxu2 %v242_v57  ;;  %450 = vmatpush.msrb.mxu0 %v110_v59  ;;  %v139_v46 = vld [vmem:[#allocation6 + $0x170] sm:$0xff] }
  0x65   :  { %509 = vmatpush.msrb.mxu3 %v306_v58  ;;  %470 = vmatpush.msrb.mxu1 %v174_v60  ;;  %v203_v47 = vld [vmem:[#allocation6 + $0x370] sm:$0xff] }
  0x66   :  { %490 = vmatpush.msrb.mxu2 %v238_v61  ;;  %451 = vmatpush.msrb.mxu0 %v106_v63  ;;  %v267_v48 = vld [vmem:[#allocation6 + $0x570] sm:$0xff] }
  0x67   :  { %510 = vmatpush.msrb.mxu3 %v302_v62  ;;  %471 = vmatpush.msrb.mxu1 %v170_v4  ;;  %v331_v49 = vld [vmem:[#allocation6 + $0x770] sm:$0xff] }
  0x68   :  { %491 = vmatpush.msrb.mxu2 %v234_v5  ;;  %452 = vmatpush.msrb.mxu0 %v102_v7  ;;  %v135_v50 = vld [vmem:[#allocation6 + $0x150] sm:$0xff] }
  0x69   :  { %511 = vmatpush.msrb.mxu3 %v298_v6  ;;  %472 = vmatpush.msrb.mxu1 %v166_v8  ;;  %v199_v51 = vld [vmem:[#allocation6 + $0x350] sm:$0xff] }
  0x6a   :  { %492 = vmatpush.msrb.mxu2 %v230_v9  ;;  %453 = vmatpush.msrb.mxu0 %v98_v11  ;;  %v263_v52 = vld [vmem:[#allocation6 + $0x550] sm:$0xff] }
  0x6b   :  { %512 = vmatpush.msrb.mxu3 %v294_v10  ;;  %473 = vmatpush.msrb.mxu1 %v162_v12  ;;  %v327_v53 = vld [vmem:[#allocation6 + $0x750] sm:$0xff] }
  0x6c   :  { %493 = vmatpush.msrb.mxu2 %v226_v13  ;;  %454 = vmatpush.msrb.mxu0 %v94_v15  ;;  %v131_v54 = vld [vmem:[#allocation6 + $0x130] sm:$0xff] }
  0x6d   :  { %513 = vmatpush.msrb.mxu3 %v290_v14  ;;  %474 = vmatpush.msrb.mxu1 %v158_v16  ;;  %v195_v55 = vld [vmem:[#allocation6 + $0x330] sm:$0xff] }
  0x6e   :  { %494 = vmatpush.msrb.mxu2 %v222_v17  ;;  %v259_v56 = vld [vmem:[#allocation6 + $0x530] sm:$0xff] }
  0x6f   :  { %514 = vmatpush.msrb.mxu3 %v286_v18  ;;  %v323_v57 = vld [vmem:[#allocation6 + $0x730] sm:$0xff] }
  0x70   :  { %v127_v58 = vld [vmem:[#allocation6 + $0x110] sm:$0xff] }
  0x71   :  { %v191_v59 = vld [vmem:[#allocation6 + $0x310] sm:$0xff] }
  0x72   :  { %v255_v60 = vld [vmem:[#allocation6 + $0x510] sm:$0xff] }
  0x73   :  { %v319_v61 = vld [vmem:[#allocation6 + $0x710] sm:$0xff] }
  0x74   :  { %v123_v62 = vld [vmem:[#allocation6 + $0xf0] sm:$0xff] }
  0x75   :  { %v187_v63 = vld [vmem:[#allocation6 + $0x2f0] sm:$0xff] }
  0x76   :  { %v251_v4 = vld [vmem:[#allocation6 + $0x4f0] sm:$0xff] }
  0x77   :  { %v315_v5 = vld [vmem:[#allocation6 + $0x6f0] sm:$0xff] }
  0x78   :  { %v119_v6 = vld [vmem:[#allocation6 + $0xd0] sm:$0xff] }
  0x79   :  { %v183_v7 = vld [vmem:[#allocation6 + $0x2d0] sm:$0xff] }
  0x7a   :  { %v247_v8 = vld [vmem:[#allocation6 + $0x4d0] sm:$0xff] }
  0x7b   :  { %v311_v9 = vld [vmem:[#allocation6 + $0x6d0] sm:$0xff] }
  0x7c   :  { %v115_v10 = vld [vmem:[#allocation6 + $0xb0] sm:$0xff] }
  0x7d   :  { %v179_v11 = vld [vmem:[#allocation6 + $0x2b0] sm:$0xff] }
  0x7e   :  { %v243_v12 = vld [vmem:[#allocation6 + $0x4b0] sm:$0xff] }
  0x7f   :  { %v307_v13 = vld [vmem:[#allocation6 + $0x6b0] sm:$0xff] }
  0x80   :  { %v111_v14 = vld [vmem:[#allocation6 + $0x90] sm:$0xff] }
  0x81   :  { %v175_v15 = vld [vmem:[#allocation6 + $0x290] sm:$0xff] }
  0x82   :  { %v239_v16 = vld [vmem:[#allocation6 + $0x490] sm:$0xff] }
  0x83   :  { %v303_v17 = vld [vmem:[#allocation6 + $0x690] sm:$0xff] }
  0x84   :  { %v107_v18 = vld [vmem:[#allocation6 + $0x70] sm:$0xff] }
  0x8a   :  { %v74_v19 = vpop.xlane.xlu0 %73 }
  0x8b   :  { %v76_v20 = vmax.f32 %v74_v19, 1e-30  ;;  %v171_v19 = vld [vmem:[#allocation6 + $0x270] sm:$0xff] }
  0x8d   :  { %747 = vrsqrt.f32 %v76_v20  ;;  %vm83_vm1 = vweird.f32 %v76_v20 }
  0x93   :  { %v748_v21 = vpop.eup %747 }
  0x94   :  { %v78_v22 = vmul.f32 %v748_v21, %v76_v20  ;;  %vm84_vm0 = vweird.f32 %v748_v21  ;;  %v235_v20 = vld [vmem:[#allocation6 + $0x470] sm:$0xff] }
  0x95   :  { %vm85_vm2 = vmor %vm83_vm1, %vm84_vm0 }
  0x96   :  { %v79_v23 = vmul.f32 %v748_v21, %v78_v22  ;;  %v103_v22 = vld [vmem:[#allocation6 + $0x50] sm:$0xff] }
  0x98   :  { %v80_v24 = vmul.f32 0.5, %v79_v23  ;;  %v167_v23 = vld [vmem:[#allocation6 + $0x250] sm:$0xff] }
  0x9a   :  { %v81_v25 = vsub.f32 1.5, %v80_v24  ;;  %v231_v24 = vld [vmem:[#allocation6 + $0x450] sm:$0xff] }
  0x9c   :  { %v82_v27 = vmul.f32 %v748_v21, %v81_v25  ;;  %v295_v25 = vld [vmem:[#allocation6 + $0x650] sm:$0xff] }
  0x9e   :  { %v86_v28 = vsel %vm85_vm2, %v748_v21, %v82_v27  ;;  %v299_v21 = vld [vmem:[#allocation6 + $0x670] sm:$0xff] }
  0x9f   :  { %v88_v29 = vmul.f32 %v87_v26, %v86_v28  ;;  %v99_v26 = vld [vmem:[#allocation6 + $0x30] sm:$0xff] }
  0xa0   :  { %v163_v27 = vld [vmem:[#allocation6 + $0x230] sm:$0xff] }
  0xa1   :  { %v921_v30 = vmul.f32 %v88_v29, %v901_v0  ;;  %v924_v31 = vmul.f32 %v88_v29, %v903_v1  ;;  %v927_v32 = vmul.f32 %v88_v29, %v905_v2  ;;  %v930_v33 = vmul.f32 %v88_v29, %v907_v3  ;;  %v151_v0 = vld [vmem:[#allocation6 + $0x1d0] sm:$0xff] }
  0xa2   :  { %v215_v1 = vld [vmem:[#allocation6 + $0x3d0] sm:$0xff] }
  0xa3   :  { %375 = vmatmul.f32.vlgmr.msra.gmra.mxu0 %v921_v30  ;;  %395 = vmatmul.f32.vlgmr.msra.gmra.mxu1 %v924_v31  ;;  %v279_v2 = vld [vmem:[#allocation6 + $0x5d0] sm:$0xff] }
  0xa4   :  { %415 = vmatmul.f32.vlgmr.msra.gmra.mxu2 %v927_v32  ;;  %435 = vmatmul.f32.vlgmr.msra.gmra.mxu3 %v930_v33  ;;  %v147_v3 = vld [vmem:[#allocation6 + $0x1b0] sm:$0xff] }
  0xa5   :  { %519 = vmatpush.msra.mxu0 %v155_v34  ;;  %539 = vmatpush.msra.mxu1 %v219_v35  ;;  %v227_v28 = vld [vmem:[#allocation6 + $0x430] sm:$0xff] }
  0xa6   :  { %559 = vmatpush.msra.mxu2 %v283_v36  ;;  %579 = vmatpush.msra.mxu3 %v347_v37  ;;  %v291_v29 = vld [vmem:[#allocation6 + $0x630] sm:$0xff] }
  0xa7   :  { %520 = vmatpush.msra.mxu0 %v151_v0  ;;  %540 = vmatpush.msra.mxu1 %v215_v1  ;;  %v95_v34 = vld [vmem:[#allocation6 + $0x10] sm:$0xff]  ;;  %v156_v0 = vld [vmem:[#allocation6 + $0x1f8] sm:$0xff] }
  0xa8   :  { %560 = vmatpush.msra.mxu2 %v279_v2  ;;  %580 = vmatpush.msra.mxu3 %v343_v38  ;;  %v159_v35 = vld [vmem:[#allocation6 + $0x210] sm:$0xff]  ;;  %v220_v1 = vld [vmem:[#allocation6 + $0x3f8] sm:$0xff] }
  0xa9   :  { %521 = vmatpush.msra.mxu0 %v147_v3  ;;  %541 = vmatpush.msra.mxu1 %v211_v39  ;;  %v223_v36 = vld [vmem:[#allocation6 + $0x410] sm:$0xff]  ;;  %v284_v2 = vld [vmem:[#allocation6 + $0x5f8] sm:$0xff] }
  0xaa   :  { %561 = vmatpush.msra.mxu2 %v275_v40  ;;  %581 = vmatpush.msra.mxu3 %v339_v41  ;;  %v287_v37 = vld [vmem:[#allocation6 + $0x610] sm:$0xff]  ;;  %v348_v38 = vld [vmem:[#allocation6 + $0x7f8] sm:$0xff] }
  0xab   :  { %522 = vmatpush.msra.mxu0 %v143_v42  ;;  %542 = vmatpush.msra.mxu1 %v207_v43  ;;  %v152_v3 = vld [vmem:[#allocation6 + $0x1d8] sm:$0xff] }
  0xac   :  { %562 = vmatpush.msra.mxu2 %v271_v44  ;;  %582 = vmatpush.msra.mxu3 %v335_v45  ;;  %v216_v39 = vld [vmem:[#allocation6 + $0x3d8] sm:$0xff] }
  0xad   :  { %455 = vmatmul.f32.vlgmr.msrb.gmra.mxu0 %v921_v30  ;;  %475 = vmatmul.f32.vlgmr.msrb.gmra.mxu1 %v924_v31  ;;  %v280_v40 = vld [vmem:[#allocation6 + $0x5d8] sm:$0xff] }
  0xae   :  { %495 = vmatmul.f32.vlgmr.msrb.gmra.mxu2 %v927_v32  ;;  %515 = vmatmul.f32.vlgmr.msrb.gmra.mxu3 %v930_v33  ;;  %v344_v41 = vld [vmem:[#allocation6 + $0x7d8] sm:$0xff] }
  0xaf   :  { %523 = vmatpush.msra.mxu0 %v139_v46  ;;  %543 = vmatpush.msra.mxu1 %v203_v47  ;;  %v148_v42 = vld [vmem:[#allocation6 + $0x1b8] sm:$0xff] }
  0xb0   :  { %563 = vmatpush.msra.mxu2 %v267_v48  ;;  %583 = vmatpush.msra.mxu3 %v331_v49  ;;  %v212_v43 = vld [vmem:[#allocation6 + $0x3b8] sm:$0xff] }
  0xb1   :  { %524 = vmatpush.msra.mxu0 %v135_v50  ;;  %544 = vmatpush.msra.mxu1 %v199_v51  ;;  %v276_v44 = vld [vmem:[#allocation6 + $0x5b8] sm:$0xff] }
  0xb2   :  { %564 = vmatpush.msra.mxu2 %v263_v52  ;;  %584 = vmatpush.msra.mxu3 %v327_v53  ;;  %v340_v45 = vld [vmem:[#allocation6 + $0x7b8] sm:$0xff] }
  0xb3   :  { %525 = vmatpush.msra.mxu0 %v131_v54  ;;  %545 = vmatpush.msra.mxu1 %v195_v55  ;;  %v144_v46 = vld [vmem:[#allocation6 + $0x198] sm:$0xff] }
  0xb4   :  { %565 = vmatpush.msra.mxu2 %v259_v56  ;;  %585 = vmatpush.msra.mxu3 %v323_v57  ;;  %v208_v47 = vld [vmem:[#allocation6 + $0x398] sm:$0xff] }
  0xb5   :  { %526 = vmatpush.msra.mxu0 %v127_v58  ;;  %546 = vmatpush.msra.mxu1 %v191_v59  ;;  %v272_v48 = vld [vmem:[#allocation6 + $0x598] sm:$0xff] }
  0xb6   :  { %566 = vmatpush.msra.mxu2 %v255_v60  ;;  %586 = vmatpush.msra.mxu3 %v319_v61  ;;  %v336_v49 = vld [vmem:[#allocation6 + $0x798] sm:$0xff] }
  0xb7   :  { %527 = vmatpush.msra.mxu0 %v123_v62  ;;  %547 = vmatpush.msra.mxu1 %v187_v63  ;;  %v140_v50 = vld [vmem:[#allocation6 + $0x178] sm:$0xff] }
  0xb8   :  { %567 = vmatpush.msra.mxu2 %v251_v4  ;;  %587 = vmatpush.msra.mxu3 %v315_v5  ;;  %v204_v51 = vld [vmem:[#allocation6 + $0x378] sm:$0xff] }
  0xb9   :  { %528 = vmatpush.msra.mxu0 %v119_v6  ;;  %548 = vmatpush.msra.mxu1 %v183_v7  ;;  %v268_v52 = vld [vmem:[#allocation6 + $0x578] sm:$0xff] }
  0xba   :  { %568 = vmatpush.msra.mxu2 %v247_v8  ;;  %588 = vmatpush.msra.mxu3 %v311_v9  ;;  %v332_v53 = vld [vmem:[#allocation6 + $0x778] sm:$0xff] }
  0xbb   :  { %529 = vmatpush.msra.mxu0 %v115_v10  ;;  %549 = vmatpush.msra.mxu1 %v179_v11  ;;  %v136_v54 = vld [vmem:[#allocation6 + $0x158] sm:$0xff] }
  0xbc   :  { %569 = vmatpush.msra.mxu2 %v243_v12  ;;  %589 = vmatpush.msra.mxu3 %v307_v13  ;;  %v200_v55 = vld [vmem:[#allocation6 + $0x358] sm:$0xff] }
  0xbd   :  { %530 = vmatpush.msra.mxu0 %v111_v14  ;;  %550 = vmatpush.msra.mxu1 %v175_v15  ;;  %v264_v56 = vld [vmem:[#allocation6 + $0x558] sm:$0xff] }
  0xbe   :  { %570 = vmatpush.msra.mxu2 %v239_v16  ;;  %590 = vmatpush.msra.mxu3 %v303_v17  ;;  %v328_v57 = vld [vmem:[#allocation6 + $0x758] sm:$0xff] }
  0xbf   :  { %531 = vmatpush.msra.mxu0 %v107_v18  ;;  %551 = vmatpush.msra.mxu1 %v171_v19  ;;  %v132_v58 = vld [vmem:[#allocation6 + $0x138] sm:$0xff] }
  0xc0   :  { %571 = vmatpush.msra.mxu2 %v235_v20  ;;  %591 = vmatpush.msra.mxu3 %v299_v21  ;;  %v196_v59 = vld [vmem:[#allocation6 + $0x338] sm:$0xff] }
  0xc1   :  { %532 = vmatpush.msra.mxu0 %v103_v22  ;;  %552 = vmatpush.msra.mxu1 %v167_v23  ;;  %v260_v60 = vld [vmem:[#allocation6 + $0x538] sm:$0xff] }
  0xc2   :  { %572 = vmatpush.msra.mxu2 %v231_v24  ;;  %592 = vmatpush.msra.mxu3 %v295_v25  ;;  %v324_v61 = vld [vmem:[#allocation6 + $0x738] sm:$0xff] }
  0xc3   :  { %533 = vmatpush.msra.mxu0 %v99_v26  ;;  %553 = vmatpush.msra.mxu1 %v163_v27  ;;  %v128_v62 = vld [vmem:[#allocation6 + $0x118] sm:$0xff] }
  0xc4   :  { %573 = vmatpush.msra.mxu2 %v227_v28  ;;  %593 = vmatpush.msra.mxu3 %v291_v29  ;;  %v192_v63 = vld [vmem:[#allocation6 + $0x318] sm:$0xff] }
  0xc5   :  { %534 = vmatpush.msra.mxu0 %v95_v34  ;;  %554 = vmatpush.msra.mxu1 %v159_v35  ;;  %v256_v4 = vld [vmem:[#allocation6 + $0x518] sm:$0xff] }
  0xc6   :  { %574 = vmatpush.msra.mxu2 %v223_v36  ;;  %594 = vmatpush.msra.mxu3 %v287_v37  ;;  %v320_v5 = vld [vmem:[#allocation6 + $0x718] sm:$0xff] }
  0xc7   :  { %535 = vmatmul.f32.vlgmr.msra.gmra.mxu0 %v921_v30  ;;  %555 = vmatmul.f32.vlgmr.msra.gmra.mxu1 %v924_v31  ;;  %v124_v6 = vld [vmem:[#allocation6 + $0xf8] sm:$0xff] }
  0xc8   :  { %575 = vmatmul.f32.vlgmr.msra.gmra.mxu2 %v927_v32  ;;  %595 = vmatmul.f32.vlgmr.msra.gmra.mxu3 %v930_v33  ;;  %v188_v7 = vld [vmem:[#allocation6 + $0x2f8] sm:$0xff] }
  0xc9   :  { %599 = vmatpush.msrb.mxu0 %v156_v0  ;;  %619 = vmatpush.msrb.mxu1 %v220_v1  ;;  %v252_v8 = vld [vmem:[#allocation6 + $0x4f8] sm:$0xff] }
  0xca   :  { %639 = vmatpush.msrb.mxu2 %v284_v2  ;;  %659 = vmatpush.msrb.mxu3 %v348_v38  ;;  %v316_v9 = vld [vmem:[#allocation6 + $0x6f8] sm:$0xff] }
  0xcb   :  { %600 = vmatpush.msrb.mxu0 %v152_v3  ;;  %620 = vmatpush.msrb.mxu1 %v216_v39  ;;  %v120_v10 = vld [vmem:[#allocation6 + $0xd8] sm:$0xff] }
  0xcc   :  { %640 = vmatpush.msrb.mxu2 %v280_v40  ;;  %660 = vmatpush.msrb.mxu3 %v344_v41  ;;  %v184_v11 = vld [vmem:[#allocation6 + $0x2d8] sm:$0xff] }
  0xcd   :  { %601 = vmatpush.msrb.mxu0 %v148_v42  ;;  %621 = vmatpush.msrb.mxu1 %v212_v43  ;;  %v248_v12 = vld [vmem:[#allocation6 + $0x4d8] sm:$0xff] }
  0xce   :  { %641 = vmatpush.msrb.mxu2 %v276_v44  ;;  %661 = vmatpush.msrb.mxu3 %v340_v45  ;;  %v312_v13 = vld [vmem:[#allocation6 + $0x6d8] sm:$0xff] }
  0xcf   :  { %602 = vmatpush.msrb.mxu0 %v144_v46  ;;  %622 = vmatpush.msrb.mxu1 %v208_v47  ;;  %v116_v14 = vld [vmem:[#allocation6 + $0xb8] sm:$0xff]  ;;  %v349_v46 = vld [vmem:[#allocation8] sm:$0xf] }
  0xd0   :  { %642 = vmatpush.msrb.mxu2 %v272_v48  ;;  %662 = vmatpush.msrb.mxu3 %v336_v49  ;;  %v180_v15 = vld [vmem:[#allocation6 + $0x2b8] sm:$0xff]  ;;  %v352_v48 = vperm.slane %v349_v46, 1  ;;  %v351_v49 = vperm.slane %v349_v46, 0 }
  0xd1   :  { %603 = vmatpush.msrb.mxu0 %v140_v50  ;;  %623 = vmatpush.msrb.mxu1 %v204_v51  ;;  %v244_v16 = vld [vmem:[#allocation6 + $0x4b8] sm:$0xff]  ;;  %v353_v50 = vperm.slane %v349_v46, 2 }
  0xd2   :  { %643 = vmatpush.msrb.mxu2 %v268_v52  ;;  %663 = vmatpush.msrb.mxu3 %v332_v53  ;;  %v308_v17 = vld [vmem:[#allocation6 + $0x6b8] sm:$0xff] }
  0xd3   :  { %604 = vmatpush.msrb.mxu0 %v136_v54  ;;  %624 = vmatpush.msrb.mxu1 %v200_v55  ;;  %v112_v18 = vld [vmem:[#allocation6 + $0x98] sm:$0xff] }
  0xd4   :  { %644 = vmatpush.msrb.mxu2 %v264_v56  ;;  %664 = vmatpush.msrb.mxu3 %v328_v57  ;;  %v176_v19 = vld [vmem:[#allocation6 + $0x298] sm:$0xff] }
  0xd5   :  { %605 = vmatpush.msrb.mxu0 %v132_v58  ;;  %625 = vmatpush.msrb.mxu1 %v196_v59  ;;  %v240_v20 = vld [vmem:[#allocation6 + $0x498] sm:$0xff] }
  0xd6   :  { %645 = vmatpush.msrb.mxu2 %v260_v60  ;;  %665 = vmatpush.msrb.mxu3 %v324_v61  ;;  %v304_v21 = vld [vmem:[#allocation6 + $0x698] sm:$0xff] }
  0xd7   :  { %606 = vmatpush.msrb.mxu0 %v128_v62  ;;  %626 = vmatpush.msrb.mxu1 %v192_v63  ;;  %v108_v22 = vld [vmem:[#allocation6 + $0x78] sm:$0xff] }
  0xd8   :  { %646 = vmatpush.msrb.mxu2 %v256_v4  ;;  %666 = vmatpush.msrb.mxu3 %v320_v5  ;;  %v172_v23 = vld [vmem:[#allocation6 + $0x278] sm:$0xff] }
  0xd9   :  { %607 = vmatpush.msrb.mxu0 %v124_v6  ;;  %627 = vmatpush.msrb.mxu1 %v188_v7  ;;  %v236_v24 = vld [vmem:[#allocation6 + $0x478] sm:$0xff] }
  0xda   :  { %647 = vmatpush.msrb.mxu2 %v252_v8  ;;  %667 = vmatpush.msrb.mxu3 %v316_v9  ;;  %v300_v25 = vld [vmem:[#allocation6 + $0x678] sm:$0xff] }
  0xdb   :  { %608 = vmatpush.msrb.mxu0 %v120_v10  ;;  %628 = vmatpush.msrb.mxu1 %v184_v11  ;;  %v104_v26 = vld [vmem:[#allocation6 + $0x58] sm:$0xff] }
  0xdc   :  { %648 = vmatpush.msrb.mxu2 %v248_v12  ;;  %668 = vmatpush.msrb.mxu3 %v312_v13  ;;  %v168_v27 = vld [vmem:[#allocation6 + $0x258] sm:$0xff] }
  0xdd   :  { %609 = vmatpush.msrb.mxu0 %v116_v14  ;;  %629 = vmatpush.msrb.mxu1 %v180_v15  ;;  %v232_v28 = vld [vmem:[#allocation6 + $0x458] sm:$0xff] }
  0xde   :  { %649 = vmatpush.msrb.mxu2 %v244_v16  ;;  %669 = vmatpush.msrb.mxu3 %v308_v17  ;;  %v296_v29 = vld [vmem:[#allocation6 + $0x658] sm:$0xff] }
  0xdf   :  { %610 = vmatpush.msrb.mxu0 %v112_v18  ;;  %630 = vmatpush.msrb.mxu1 %v176_v19  ;;  %v100_v34 = vld [vmem:[#allocation6 + $0x38] sm:$0xff] }
  0xe0   :  { %650 = vmatpush.msrb.mxu2 %v240_v20  ;;  %670 = vmatpush.msrb.mxu3 %v304_v21  ;;  %v164_v35 = vld [vmem:[#allocation6 + $0x238] sm:$0xff] }
  0xe1   :  { %611 = vmatpush.msrb.mxu0 %v108_v22  ;;  %631 = vmatpush.msrb.mxu1 %v172_v23  ;;  %v228_v36 = vld [vmem:[#allocation6 + $0x438] sm:$0xff] }
  0xe2   :  { %651 = vmatpush.msrb.mxu2 %v236_v24  ;;  %671 = vmatpush.msrb.mxu3 %v300_v25  ;;  %v292_v37 = vld [vmem:[#allocation6 + $0x638] sm:$0xff] }
  0xe3   :  { %612 = vmatpush.msrb.mxu0 %v104_v26  ;;  %632 = vmatpush.msrb.mxu1 %v168_v27  ;;  %v96_v0 = vld [vmem:[#allocation6 + $0x18] sm:$0xff] }
  0xe4   :  { %652 = vmatpush.msrb.mxu2 %v232_v28  ;;  %672 = vmatpush.msrb.mxu3 %v296_v29  ;;  %v160_v1 = vld [vmem:[#allocation6 + $0x218] sm:$0xff] }
  0xe5   :  { %613 = vmatpush.msrb.mxu0 %v100_v34  ;;  %633 = vmatpush.msrb.mxu1 %v164_v35  ;;  %v224_v2 = vld [vmem:[#allocation6 + $0x418] sm:$0xff] }
  0xe6   :  { %v288_v38 = vld [vmem:[#allocation6 + $0x618] sm:$0xff]  ;;  %653 = vmatpush.msrb.mxu2 %v228_v36  ;;  %673 = vmatpush.msrb.mxu3 %v292_v37 }
  0xe7   :  { %614 = vmatpush.msrb.mxu0 %v96_v0  ;;  %634 = vmatpush.msrb.mxu1 %v160_v1 }
  0xe8   :  { %654 = vmatpush.msrb.mxu2 %v224_v2  ;;  %674 = vmatpush.msrb.mxu3 %v288_v38 }
  0xe9   :  { %615 = vmatmul.f32.vlgmr.msrb.gmra.mxu0 %v921_v30  ;;  %635 = vmatmul.f32.vlgmr.msrb.gmra.mxu1 %v924_v31  ;;  %v354_v31 = vperm.slane %v349_v46, 3 }
  0xea   :  { %655 = vmatmul.f32.vlgmr.msrb.gmra.mxu2 %v927_v32  ;;  %675 = vmatmul.f32.vlgmr.msrb.gmra.mxu3 %v930_v33 }
 0x120   :  { %v376_v3 = vpop.f32.mrf.mxu0  ;;  %v396_v39 = vpop.f32.mrf.mxu1 }
 0x121   :  { %v377_v32 = vadd.f32 %v376_v3, %v351_v49 }
 0x123   :  { %v397_v57 = vadd.f32 %v396_v39, %v377_v32 }
 0x127   :  { %v416_v40 = vpop.f32.mrf.mxu2  ;;  %v436_v41 = vpop.f32.mrf.mxu3 }
 0x128   :  { %v417_v61 = vadd.f32 %v416_v40, %v397_v57 }
 0x12a   :  { %v456_v42 = vpop.f32.mrf.mxu0  ;;  %v476_v43 = vpop.f32.mrf.mxu1  ;;  %v437_v8 = vadd.f32 %v436_v41, %v417_v61 }
 0x12b   :  { %v457_v51 = vadd.f32 %v456_v42, %v352_v48 }
 0x12d   :  { %v477_v55 = vadd.f32 %v476_v43, %v457_v51 }
 0x131   :  { %v496_v44 = vpop.f32.mrf.mxu2  ;;  %v516_v47 = vpop.f32.mrf.mxu3 }
 0x132   :  { %v497_v58 = vadd.f32 %v496_v44, %v477_v55 }
 0x134   :  { %v517_v5 = vadd.f32 %v516_v47, %v497_v58 }
 0x136   :  { %v679_v11 = vmax.f32 %v437_v8, %v517_v5 }
 0x144   :  { %v536_v45 = vpop.f32.mrf.mxu0  ;;  %v556_v30 = vpop.f32.mrf.mxu1 }
 0x145   :  { %v537_v53 = vadd.f32 %v536_v45, %v353_v50 }
 0x147   :  { %v557_v59 = vadd.f32 %v556_v30, %v537_v53 }
 0x14b   :  { %v576_v52 = vpop.f32.mrf.mxu2  ;;  %v596_v54 = vpop.f32.mrf.mxu3 }
 0x14c   :  { %v577_v62 = vadd.f32 %v576_v52, %v557_v59 }
 0x14e   :  { %v597_v9 = vadd.f32 %v596_v54, %v577_v62 }
 0x166   :  { %v616_v33 = vpop.f32.mrf.mxu0  ;;  %v636_v60 = vpop.f32.mrf.mxu1 }
 0x167   :  { %v617_v56 = vadd.f32 %v616_v33, %v354_v31 }
 0x169   :  { %v637_v63 = vadd.f32 %v636_v60, %v617_v56 }
 0x16d   :  { %v656_v4 = vpop.f32.mrf.mxu2  ;;  %v676_v7 = vpop.f32.mrf.mxu3 }
 0x16e   :  { %v657_v6 = vadd.f32 %v656_v4, %v637_v63 }
 0x170   :  { %v677_v10 = vadd.f32 %v676_v7, %v657_v6 }
 0x172   :  { %v680_v12 = vmax.f32 %v597_v9, %v677_v10 }
 0x174   :  { %v681_v13 = vmax.f32 %v679_v11, %v680_v12 }
 0x176   :  { %682 = vmax.xlane.f32.xlu0 %v681_v13 }
 0x1e9   :  { %v683_v14 = vpop.xlane.xlu0 %682 }
 0x1ea   :  { %v684_v15 = vsub.f32 %v437_v8, %v683_v14  ;;  %v685_v16 = vsub.f32 %v517_v5, %v683_v14  ;;  %v686_v17 = vsub.f32 %v597_v9, %v683_v14  ;;  %v687_v18 = vsub.f32 %v677_v10, %v683_v14 }
 0x1ec   :  { %v688_v19 = vmul.f32 1.442695, %v684_v15  ;;  %v690_v20 = vmul.f32 1.442695, %v685_v16  ;;  %v692_v21 = vmul.f32 1.442695, %v686_v17 }
 0x1ed   :  { %v694_v22 = vmul.f32 1.442695, %v687_v18 }
 0x1ee   :  { %749 = vpow2.f32 %v688_v19 }
 0x1ef   :  { %751 = vpow2.f32 %v690_v20 }
 0x1f0   :  { %753 = vpow2.f32 %v692_v21 }
 0x1f1   :  { %755 = vpow2.f32 %v694_v22 }
 0x1f4   :  { %v750_v23 = vpop.eup %749 }
 0x1f5   :  { %v752_v24 = vpop.eup %751 }
 0x1f6   :  { %v696_v25 = vadd.f32 %v752_v24, %v750_v23  ;;  %v754_v26 = vpop.eup %753 }
 0x1f7   :  { %v756_v28 = vpop.eup %755 }
 0x1f8   :  { %v697_v27 = vadd.f32 %v754_v26, %v696_v25 }
 0x1fa   :  { %v698_v29 = vadd.f32 %v756_v28, %v697_v27 }
 0x1fc   :  { %699 = vadd.xlane.f32.xlu1 %v698_v29 }
 0x26f   :  { %v700_v34 = vpop.xlane.xlu1 %699 }
 0x270   :  { %757 = vrcp.f32 %v700_v34  ;;  %v712_v0 = vand.u32 2147483648, %v700_v34  ;;  %v710_v2 = vand.u32 2147483647, %v700_v34  ;;  %vm706_vm4 = vweird.f32 %v700_v34 }
 0x272   :  { %v713_v3 = vor.u32 1.1754944e-38, %v712_v0  ;;  %vm711_vm6 = vcmp.eq.f32.partialorder %v710_v2, 8.507059e+37 }
 0x276   :  { %v758_v35 = vpop.eup %757 }
 0x277   :  { %v702_v36 = vmul.f32 %v758_v35, %v700_v34  ;;  %vm707_vm3 = vweird.f32 %v758_v35 }
 0x278   :  { %vm708_vm5 = vmor %vm706_vm4, %vm707_vm3 }
 0x279   :  { %v703_v37 = vsub.f32 1.0, %v702_v36 }
 0x27b   :  { %v704_v1 = vmul.f32 %v758_v35, %v703_v37 }
 0x27d   :  { %v705_v38 = vadd.f32 %v758_v35, %v704_v1 }
 0x27f   :  { %v709_v39 = vsel %vm708_vm5, %v758_v35, %v705_v38 }
 0x280   :  { %v714_v40 = vsel %vm711_vm6, %v713_v3, %v709_v39 }
 0x281   :  { %v715_v41 = vmul.f32 %v750_v23, %v714_v40  ;;  %v716_v42 = vmul.f32 %v752_v24, %v714_v40  ;;  %v717_v43 = vmul.f32 %v754_v26, %v714_v40  ;;  %v718_v44 = vmul.f32 %v756_v28, %v714_v40 }
 0x283   :  { %719 = vst [vmem:[#allocation9] sm:$0xff] %v715_v41 }
 0x284   :  { %720 = vst [vmem:[#allocation9 + $0x8] sm:$0xff] %v716_v42 }
 0x285   :  { %721 = vst [vmem:[#allocation9 + $0x10] sm:$0xff] %v717_v43 }
 0x286   :  { %722 = vst [vmem:[#allocation9 + $0x18] sm:$0xff] %v718_v44 }
 0x287   :  { %733 = dma.vmem_to_hbm [thread:$0]  %s729_s5, 512, %s731_s8, [#allocation5]  }
 0x288   :  { %859 = dma.done.wait [#allocation5], 512  }
 0x289   :  { %860 = vsyncadd [#allocation5], 4294966784 }
 0x28a   :  { %738 = vsyncpa [#allocation4], 1 }
 0x28b   :  { %739 = vsyncpa [#allocation7], 1 }
 0x28c   :  { %740 = vsyncpa [#allocation5], 1 }

</bundles_post_ra>
